<compile_context>
chip_gen: v7x
topology: tpu7x:2x2x1
jax: 0.10.0
libtpu: 0.0.40
codegen_flags: <defaults>
</compile_context>

<pallas_src>
import functools

import jax
import jax.numpy as jnp
from jax.experimental import pallas as pl
from jax.experimental.pallas import tpu as pltpu


def _vmem_limit_bytes(nbytes):
    """Scoped-VMEM request: footprint + generous headroom, floored at the
    32 MiB default and capped at 128 MiB."""
    return int(min(max(2 * nbytes + (4 << 20), 32 << 20), 128 << 20))


# ----------------------------------------------------------------------------
# Fused multi-head attention + residual + LayerNorm (one grid step per batch)
# ----------------------------------------------------------------------------
def _mha_addln_kernel(xq_ref, xkv_ref, m_ref, wq_ref, bq_ref, wkv_ref, bkv_ref,
                      wo_ref, bo_ref, g_ref, bt_ref, o_ref, attn_ref,
                      *, num_head, head_dim, eps):
    xq = xq_ref[0]                                # [Sq, D] f32 (residual path)
    xq_b = xq.astype(jnp.bfloat16)                # bf16 MXU operand
    xkv_b = xkv_ref[0].astype(jnp.bfloat16)       # [Sk, D]
    keep = m_ref[0].astype(jnp.float32) > 0.0     # int8 mask -> bool

    d_model = num_head * head_dim

    # Q projection (1/sqrt(Dh) already folded into wq/bq) and fused K/V
    # projection: bf16 operands, f32 accumulation on the MXU.
    q = jnp.dot(xq_b, wq_ref[...], preferred_element_type=jnp.float32) + bq_ref[...]
    kv = jnp.dot(xkv_b, wkv_ref[...], preferred_element_type=jnp.float32) + bkv_ref[...]
    k = kv[:, :d_model]
    v = kv[:, d_model:]

    neg = jnp.float32(-1e9)

    # Per-head attention; each head's output lands in the [Sq, D] scratch at
    # lane offset h*Dh so the Wo projection below runs with full K = D.
    # TODO(synk): heads still live on the lane axis (fine for Dh >= 128);
    #             for small Dh move heads to a leading batch axis and use a
    #             lax.fori_loop / batched dot_general for large num_head.
    for h in range(num_head):
        lo, hi = h * head_dim, (h + 1) * head_dim
        qh = q[:, lo:hi].astype(jnp.bfloat16)
        kh = k[:, lo:hi].astype(jnp.bfloat16)
        vh = v[:, lo:hi].astype(jnp.bfloat16)
        # q @ k^T expressed as a contraction on the head dim (no in-kernel .T).
        s = jax.lax.dot_general(qh, kh, (((1,), (1,)), ((), ())),
                                preferred_element_type=jnp.float32)  # [Sq, Sk]
        s = jnp.where(keep, s, neg)
        s = s - jnp.max(s, axis=-1, keepdims=True)
        p = jnp.exp(s)
        denom = jnp.sum(p, axis=-1, keepdims=True)
        # EUP approximate reciprocal + one Newton step (f32-accurate) keeps
        # the divide off the VALU critical path.
        r = pl.reciprocal(denom, approx=True)
        r = r * (2.0 - denom * r)
        p = (p * r).astype(jnp.bfloat16)
        oh = jnp.dot(p, vh, preferred_element_type=jnp.float32)      # [Sq, Dh]
        attn_ref[:, lo:hi] = oh                                       # scratch concat

    # Single full-width output projection: [Sq, D] @ [D, D] (K = D, not Dh).
    out = jnp.dot(attn_ref[...].astype(jnp.bfloat16), wo_ref[...],
                  preferred_element_type=jnp.float32) + bo_ref[...]

    # Residual add + LayerNorm epilogue (dropout = identity in eval mode).
    y = out + xq
    mu = jnp.mean(y, axis=-1, keepdims=True)
    var = jnp.mean((y - mu) ** 2, axis=-1, keepdims=True)
    yn = (y - mu) * jax.lax.rsqrt(var + eps)
    o_ref[0] = (yn * g_ref[...] + bt_ref[...]).astype(o_ref.dtype)


def pallas_mha_add_layernorm(x_q, x_kv, mask, p, ln_g, ln_b, num_head, eps=1e-6):
    """LayerNorm(x_q + MHA(x_q, x_kv, x_kv, mask)) as one fused kernel.

    `p` holds preprocessed parameters (bf16 fused weights, scaled Wq/bq)."""
    B, Sq, D = x_q.shape
    Sk = x_kv.shape[1]
    Dh = D // num_head

    if mask.dtype != jnp.int8:
        mask = (mask != 0).astype(jnp.int8)

    kern = functools.partial(_mha_addln_kernel, num_head=num_head,
                             head_dim=Dh, eps=eps)

    # Grid-invariant operands: single-buffered (the block index never changes).
    def wspec(shape):
        return pl.BlockSpec(shape, lambda b: (0,) * len(shape),
                            pipeline_mode=pl.Buffered(1))

    flops = 2 * B * (Sq * D * D + 2 * Sk * D * D
                     + 2 * num_head * Sq * Sk * Dh + Sq * D * D)
    bytes_accessed = (4 * B * Sq * D * 2 + 4 * B * Sk * D + B * Sq * Sk
                      + 2 * 4 * D * D + 4 * 8 * D)
    cost = pl.CostEstimate(flops=int(flops),
                           transcendentals=int(B * num_head * Sq * Sk),
                           bytes_accessed=int(bytes_accessed))

    # VMEM budget: bf16 weights (single-buffered) + f32 biases/LN + activation
    # blocks (double-buffered) + scratch + live intermediates.
    wbytes = 2 * (4 * D * D) + 4 * (8 * D)
    ablk = 4 * (2 * Sq * D + Sk * D) + Sq * Sk
    live = 4 * (Sq * D + 2 * Sk * D + 2 * Sq * Sk) + 4 * Sq * D
    vlim = _vmem_limit_bytes(wbytes + 2 * ablk + live)

    return pl.pallas_call(
        kern,
        out_shape=jax.ShapeDtypeStruct((B, Sq, D), x_q.dtype),
        grid=(B,),
        in_specs=[
            pl.BlockSpec((1, Sq, D), lambda b: (b, 0, 0)),    # x_q
            pl.BlockSpec((1, Sk, D), lambda b: (b, 0, 0)),    # x_kv
            pl.BlockSpec((1, Sq, Sk), lambda b: (b, 0, 0)),   # mask (int8)
            wspec((D, D)),        # wq (scale folded in, bf16)
            wspec((1, D)),        # bq (scaled, f32)
            wspec((D, 2 * D)),    # wkv (bf16)
            wspec((1, 2 * D)),    # bkv (f32)
            wspec((D, D)),        # wo (bf16)
            wspec((1, D)),        # bo (f32)
            wspec((1, D)),        # LN gamma
            wspec((1, D)),        # LN beta
        ],
        out_specs=pl.BlockSpec((1, Sq, D), lambda b: (b, 0, 0)),
        scratch_shapes=[pltpu.VMEM((Sq, D), jnp.float32)],
        compiler_params=pltpu.CompilerParams(
            dimension_semantics=("parallel",),
            vmem_limit_bytes=vlim),
        cost_estimate=cost,
    )(x_q, x_kv, mask, p["wq"], p["bq"], p["wkv"], p["bkv"],
      p["wo"], p["bo"], ln_g, ln_b)


# ----------------------------------------------------------------------------
# Fused position-wise FFN + residual + LayerNorm
# ----------------------------------------------------------------------------
def _ffn_addln_kernel(x_ref, w1_ref, b1_ref, w2_ref, b2_ref, g_ref, bt_ref,
                      o_ref, *, eps):
    x = x_ref[...]                                                   # [tm, D] f32
    xb = x.astype(jnp.bfloat16)
    h = jnp.dot(xb, w1_ref[...], preferred_element_type=jnp.float32) + b1_ref[...]
    h = jnp.maximum(h, 0.0).astype(jnp.bfloat16)
    ff = jnp.dot(h, w2_ref[...], preferred_element_type=jnp.float32) + b2_ref[...]
    y = ff + x
    mu = jnp.mean(y, axis=-1, keepdims=True)
    var = jnp.mean((y - mu) ** 2, axis=-1, keepdims=True)
    yn = (y - mu) * jax.lax.rsqrt(var + eps)
    o_ref[...] = (yn * g_ref[...] + bt_ref[...]).astype(o_ref.dtype)


def _ffn_tiling(m):
    """(8,128)-friendly row tile; pad M up if it doesn't divide so pipelining
    survives instead of collapsing to one giant step."""
    for t in (256, 128):
        if m % t == 0:
            return t, m
    tm = 128 if m > 128 else ((m + 7) // 8) * 8
    return tm, ((m + tm - 1) // tm) * tm


def pallas_ffn_add_layernorm(x, w1, b1, w2, b2, ln_g, ln_b, eps=1e-6):
    """LayerNorm(x + FFN(x)) over rows of x: [M, D] (preprocessed params)."""
    M, D = x.shape
    F = w1.shape[1]
    tm, Mp = _ffn_tiling(M)
    xp = x if Mp == M else jnp.pad(x, ((0, Mp - M), (0, 0)))

    def wspec(shape):
        return pl.BlockSpec(shape, lambda i: (0,) * len(shape),
                            pipeline_mode=pl.Buffered(1))

    kern = functools.partial(_ffn_addln_kernel, eps=eps)
    cost = pl.CostEstimate(
        flops=int(4 * M * D * F), transcendentals=0,
        bytes_accessed=int(4 * 2 * M * D + 2 * 2 * D * F + 4 * (F + 3 * D)))

    # TODO(synk): for large d_ff (esp. v7x 64 MiB VMEM) add an F grid axis
    #             ("arbitrary") with an f32 accumulator scratch instead of
    #             keeping W1/W2 fully resident.
    wbytes = 2 * (2 * D * F) + 4 * (F + 3 * D)
    ablk = 4 * (2 * tm * D)
    live = 4 * tm * F
    vlim = _vmem_limit_bytes(wbytes + 2 * ablk + live)

    out = pl.pallas_call(
        kern,
        out_shape=jax.ShapeDtypeStruct((Mp, D), x.dtype),
        grid=(Mp // tm,),
        in_specs=[
            pl.BlockSpec((tm, D), lambda i: (i, 0)),
            wspec((D, F)),     # w1 (bf16)
            wspec((1, F)),     # b1
            wspec((F, D)),     # w2 (bf16)
            wspec((1, D)),     # b2
            wspec((1, D)),     # LN gamma
            wspec((1, D)),     # LN beta
        ],
        out_specs=pl.BlockSpec((tm, D), lambda i: (i, 0)),
        compiler_params=pltpu.CompilerParams(
            dimension_semantics=("parallel",),
            vmem_limit_bytes=vlim),
        cost_estimate=cost,
    )(xp, w1, b1, w2, b2, ln_g, ln_b)
    return out if Mp == M else out[:M]


# ----------------------------------------------------------------------------
# One-time parameter preprocessing (outside the per-call jit path)
# ----------------------------------------------------------------------------
def preprocess_params(params, num_head):
    """Fuse K/V weights, fold the 1/sqrt(Dh) scale into the Q projection,
    cast MXU weight operands to bf16, reshape biases / LN params lane-dense."""
    D = params["mha1"]["wq"].shape[0]
    F = params["ff_w1"].shape[1]
    Dh = D // num_head
    scale = 1.0 / (Dh ** 0.5)

    def prep_mha(p):
        return {
            "wq": (p["wq"] * scale).astype(jnp.bfloat16),
            "bq": (p["bq"] * scale).reshape(1, D).astype(jnp.float32),
            "wkv": jnp.concatenate([p["wk"], p["wv"]], axis=1).astype(jnp.bfloat16),
            "bkv": jnp.concatenate([p["bk"], p["bv"]]).reshape(1, 2 * D).astype(jnp.float32),
            "wo": p["wo"].astype(jnp.bfloat16),
            "bo": p["bo"].reshape(1, D).astype(jnp.float32),
        }

    return {
        "mha1": prep_mha(params["mha1"]),
        "mha2": prep_mha(params["mha2"]),
        "ff_w1": params["ff_w1"].astype(jnp.bfloat16),
        "ff_b1": params["ff_b1"].reshape(1, F).astype(jnp.float32),
        "ff_w2": params["ff_w2"].astype(jnp.bfloat16),
        "ff_b2": params["ff_b2"].reshape(1, D).astype(jnp.float32),
        "ln1_g": params["ln1_g"].reshape(1, D),
        "ln1_b": params["ln1_b"].reshape(1, D),
        "ln2_g": params["ln2_g"].reshape(1, D),
        "ln2_b": params["ln2_b"].reshape(1, D),
        "ln3_g": params["ln3_g"].reshape(1, D),
        "ln3_b": params["ln3_b"].reshape(1, D),
    }


# ----------------------------------------------------------------------------
# Decoder layer forward (3 fused Pallas kernels)
# ----------------------------------------------------------------------------
def decoder_layer_forward(prep, x, encoder_output, tgt_mask, src_mask, num_head):
    # masked self-attention + residual + LayerNorm (single fused kernel)
    first = pallas_mha_add_layernorm(
        x, x, tgt_mask, prep["mha1"], prep["ln1_g"], prep["ln1_b"], num_head)
    # cross-attention (q from decoder, k/v from encoder) + residual + LayerNorm
    second = pallas_mha_add_layernorm(
        first, encoder_output, src_mask, prep["mha2"],
        prep["ln2_g"], prep["ln2_b"], num_head)
    # position-wise feed-forward + residual + LayerNorm (single fused kernel)
    B, S, D = second.shape
    third = pallas_ffn_add_layernorm(
        second.reshape(B * S, D),
        prep["ff_w1"], prep["ff_b1"], prep["ff_w2"], prep["ff_b2"],
        prep["ln3_g"], prep["ln3_b"]).reshape(B, S, D)
    return third


# ----------------------------------------------------------------------------
# Pure-JAX f32 reference (same math, no Pallas) for a sanity check
# ----------------------------------------------------------------------------
def ref_mha(x_q, x_kv, mask, p, num_head):
    B, Sq, D = x_q.shape
    Sk = x_kv.shape[1]
    Dh = D // num_head
    q = (x_q @ p["wq"] + p["bq"]).reshape(B, Sq, num_head, Dh).transpose(0, 2, 1, 3)
    k = (x_kv @ p["wk"] + p["bk"]).reshape(B, Sk, num_head, Dh).transpose(0, 2, 1, 3)
    v = (x_kv @ p["wv"] + p["bv"]).reshape(B, Sk, num_head, Dh).transpose(0, 2, 1, 3)
    s = jnp.einsum("bhqd,bhkd->bhqk", q, k) / (Dh ** 0.5)
    s = jnp.where(mask[:, None, :, :] > 0, s, -1e9)
    p_attn = jax.nn.softmax(s, axis=-1)
    o = jnp.einsum("bhqk,bhkd->bhqd", p_attn, v)
    o = o.transpose(0, 2, 1, 3).reshape(B, Sq, D)
    return o @ p["wo"] + p["bo"]


def ref_add_ln(a, b, g, beta, eps=1e-6):
    x = a + b
    mu = x.mean(-1, keepdims=True)
    var = ((x - mu) ** 2).mean(-1, keepdims=True)
    return (x - mu) / jnp.sqrt(var + eps) * g + beta


def ref_forward(params, x, enc, tgt_mask, src_mask, num_head):
    m = ref_mha(x, x, tgt_mask, params["mha1"], num_head)
    f = ref_add_ln(m, x, params["ln1_g"], params["ln1_b"])
    c = ref_mha(f, enc, src_mask, params["mha2"], num_head)
    s = ref_add_ln(f, c, params["ln2_g"], params["ln2_b"])
    h = jnp.maximum(s @ params["ff_w1"] + params["ff_b1"], 0.0)
    ff = h @ params["ff_w2"] + params["ff_b2"]
    return ref_add_ln(s, ff, params["ln3_g"], params["ln3_b"])


# ----------------------------------------------------------------------------
def init_params(key, dim_model, num_head, d_ff):
    ks = jax.random.split(key, 16)
    std = 0.02

    def mha_params(k4):
        ka, kb, kc, kd = jax.random.split(k4, 4)
        return {
            "wq": jax.random.normal(ka, (dim_model, dim_model), jnp.float32) * std,
            "bq": jnp.zeros((dim_model,), jnp.float32),
            "wk": jax.random.normal(kb, (dim_model, dim_model), jnp.float32) * std,
            "bk": jnp.zeros((dim_model,), jnp.float32),
            "wv": jax.random.normal(kc, (dim_model, dim_model), jnp.float32) * std,
            "bv": jnp.zeros((dim_model,), jnp.float32),
            "wo": jax.random.normal(kd, (dim_model, dim_model), jnp.float32) * std,
            "bo": jnp.zeros((dim_model,), jnp.float32),
        }

    return {
        "mha1": mha_params(ks[0]),
        "mha2": mha_params(ks[1]),
        "ff_w1": jax.random.normal(ks[2], (dim_model, d_ff), jnp.float32) * std,
        "ff_b1": jnp.zeros((d_ff,), jnp.float32),
        "ff_w2": jax.random.normal(ks[3], (d_ff, dim_model), jnp.float32) * std,
        "ff_b2": jnp.zeros((dim_model,), jnp.float32),
        "ln1_g": jnp.ones((dim_model,), jnp.float32),
        "ln1_b": jnp.zeros((dim_model,), jnp.float32),
        "ln2_g": jnp.ones((dim_model,), jnp.float32),
        "ln2_b": jnp.zeros((dim_model,), jnp.float32),
        "ln3_g": jnp.ones((dim_model,), jnp.float32),
        "ln3_b": jnp.zeros((dim_model,), jnp.float32),
    }


if __name__ == "__main__":
    B, S_dec, S_enc = 2, 8, 10
    dim_model, num_head = 32, 4
    d_ff = 4 * dim_model  # PositionWiseFeedForward hidden size

    key = jax.random.PRNGKey(0)
    kx, kenc, kp = jax.random.split(key, 3)
    x = jax.random.normal(kx, (B, S_dec, dim_model), jnp.float32)
    enc_out = jax.random.normal(kenc, (B, S_enc, dim_model), jnp.float32)

    # tgt_mask: causal [B, S_dec, S_dec]; src_mask: all-ones [B, S_dec, S_enc]
    tgt_mask = jnp.broadcast_to(
        jnp.tril(jnp.ones((S_dec, S_dec), jnp.float32)), (B, S_dec, S_dec)
    )
    src_mask = jnp.ones((B, S_dec, S_enc), jnp.float32)

    params = init_params(kp, dim_model, num_head, d_ff)
    prep = preprocess_params(params, num_head)   # one-time weight fusion/cast

    fwd = jax.jit(decoder_layer_forward, static_argnums=(5,))
    out = fwd(prep, x, enc_out, tgt_mask, src_mask, num_head)
    out = jax.block_until_ready(out)

    ref = ref_forward(params, x, enc_out, tgt_mask, src_mask, num_head)
    assert out.shape == (B, S_dec, dim_model)
    assert bool(jnp.all(jnp.isfinite(out)))
    # bf16 MXU operands vs f32 reference -> slightly looser tolerance.
    assert bool(jnp.allclose(out, ref, rtol=2e-2, atol=2e-2)), "mismatch vs reference"

    print("KERNEL_OK")
</pallas_src>

<mosaic_0001>
module attributes {stable_mosaic.version = 11 : i64} {
  func.func @_mha_addln_kernel(%arg0: i32, %arg1: memref<1x8x32xf32, #tpu.memory_space<vmem>>, %arg2: memref<1x8x32xf32, #tpu.memory_space<vmem>>, %arg3: memref<1x8x8xi8, #tpu.memory_space<vmem>>, %arg4: memref<32x32xbf16, #tpu.memory_space<vmem>>, %arg5: memref<1x32xf32, #tpu.memory_space<vmem>>, %arg6: memref<32x64xbf16, #tpu.memory_space<vmem>>, %arg7: memref<1x64xf32, #tpu.memory_space<vmem>>, %arg8: memref<32x32xbf16, #tpu.memory_space<vmem>>, %arg9: memref<1x32xf32, #tpu.memory_space<vmem>>, %arg10: memref<1x32xf32, #tpu.memory_space<vmem>>, %arg11: memref<1x32xf32, #tpu.memory_space<vmem>>, %arg12: memref<1x8x32xf32, #tpu.memory_space<vmem>>, %arg13: memref<8x32xf32, #tpu.memory_space<vmem>>) attributes {dimension_semantics = [#tpu.dimension_semantics<parallel>], iteration_bounds = array<i64: 2>, scalar_prefetch = 0 : i64, scratch_operands = 1 : i64, tpu.core_type = #tpu.core_type<tc>, window_params = [{transform_indices = @transform_0, window_bounds = array<i64: 1, 8, 32>}, {transform_indices = @transform_1, window_bounds = array<i64: 1, 8, 32>}, {transform_indices = @transform_2, window_bounds = array<i64: 1, 8, 8>}, {pipeline_mode = #tpu.pipeline_mode<synchronous>, transform_indices = @transform_3, window_bounds = array<i64: 32, 32>}, {pipeline_mode = #tpu.pipeline_mode<synchronous>, transform_indices = @transform_4, window_bounds = array<i64: 1, 32>}, {pipeline_mode = #tpu.pipeline_mode<synchronous>, transform_indices = @transform_5, window_bounds = array<i64: 32, 64>}, {pipeline_mode = #tpu.pipeline_mode<synchronous>, transform_indices = @transform_6, window_bounds = array<i64: 1, 64>}, {pipeline_mode = #tpu.pipeline_mode<synchronous>, transform_indices = @transform_7, window_bounds = array<i64: 32, 32>}, {pipeline_mode = #tpu.pipeline_mode<synchronous>, transform_indices = @transform_8, window_bounds = array<i64: 1, 32>}, {pipeline_mode = #tpu.pipeline_mode<synchronous>, transform_indices = @transform_9, window_bounds = array<i64: 1, 32>}, {pipeline_mode = #tpu.pipeline_mode<synchronous>, transform_indices = @transform_10, window_bounds = array<i64: 1, 32>}, {transform_indices = @transform_11, window_bounds = array<i64: 1, 8, 32>}]} {
    %c0 = arith.constant 0 : index
    %c0_0 = arith.constant 0 : index
    %c0_1 = arith.constant 0 : index
    %0 = vector.load %arg1[%c0, %c0_0, %c0_1] : memref<1x8x32xf32, #tpu.memory_space<vmem>>, vector<1x8x32xf32>
    %1 = vector.shape_cast %0 : vector<1x8x32xf32> to vector<8x32xf32>
    %2 = arith.truncf %1 : vector<8x32xf32> to vector<8x32xbf16>
    %c0_2 = arith.constant 0 : index
    %c0_3 = arith.constant 0 : index
    %c0_4 = arith.constant 0 : index
    %3 = vector.load %arg2[%c0_2, %c0_3, %c0_4] : memref<1x8x32xf32, #tpu.memory_space<vmem>>, vector<1x8x32xf32>
    %4 = vector.shape_cast %3 : vector<1x8x32xf32> to vector<8x32xf32>
    %5 = arith.truncf %4 : vector<8x32xf32> to vector<8x32xbf16>
    %c0_5 = arith.constant 0 : index
    %c0_6 = arith.constant 0 : index
    %c0_7 = arith.constant 0 : index
    %6 = vector.load %arg3[%c0_5, %c0_6, %c0_7] : memref<1x8x8xi8, #tpu.memory_space<vmem>>, vector<1x8x8xi8>
    %7 = vector.shape_cast %6 : vector<1x8x8xi8> to vector<8x8xi8>
    %8 = arith.sitofp %7 : vector<8x8xi8> to vector<8x8xf32>
    %cst = arith.constant 0.000000e+00 : f32
    %9 = vector.broadcast %cst : f32 to vector<8x8xf32>
    %10 = arith.cmpf ogt, %8, %9 : vector<8x8xf32>
    %c0_8 = arith.constant 0 : index
    %c0_9 = arith.constant 0 : index
    %11 = vector.load %arg4[%c0_8, %c0_9] : memref<32x32xbf16, #tpu.memory_space<vmem>>, vector<32x32xbf16>
    %cst_10 = arith.constant dense<0.000000e+00> : vector<8x32xf32>
    %12 = tpu.matmul %2, %11, %cst_10 {dimension_numbers = #tpu.dot_dimension_numbers<[1], [0], [0], [1], [0, 0, 1, 1], [], []>} : vector<8x32xbf16>, vector<32x32xbf16>, vector<8x32xf32> -> vector<8x32xf32>
    %c0_11 = arith.constant 0 : index
    %c0_12 = arith.constant 0 : index
    %13 = vector.load %arg5[%c0_11, %c0_12] : memref<1x32xf32, #tpu.memory_space<vmem>>, vector<1x32xf32>
    %14 = vector.broadcast %13 : vector<1x32xf32> to vector<8x32xf32>
    %15 = arith.addf %12, %14 : vector<8x32xf32>
    %c0_13 = arith.constant 0 : index
    %c0_14 = arith.constant 0 : index
    %16 = vector.load %arg6[%c0_13, %c0_14] : memref<32x64xbf16, #tpu.memory_space<vmem>>, vector<32x64xbf16>
    %cst_15 = arith.constant dense<0.000000e+00> : vector<8x64xf32>
    %17 = tpu.matmul %5, %16, %cst_15 {dimension_numbers = #tpu.dot_dimension_numbers<[1], [0], [0], [1], [0, 0, 1, 1], [], []>} : vector<8x32xbf16>, vector<32x64xbf16>, vector<8x64xf32> -> vector<8x64xf32>
    %c0_16 = arith.constant 0 : index
    %c0_17 = arith.constant 0 : index
    %18 = vector.load %arg7[%c0_16, %c0_17] : memref<1x64xf32, #tpu.memory_space<vmem>>, vector<1x64xf32>
    %19 = vector.broadcast %18 : vector<1x64xf32> to vector<8x64xf32>
    %20 = arith.addf %17, %19 : vector<8x64xf32>
    %21 = vector.extract_strided_slice %20 {offsets = [0, 0], sizes = [8, 32], strides = [1, 1]} : vector<8x64xf32> to vector<8x32xf32>
    %22 = vector.extract_strided_slice %20 {offsets = [0, 32], sizes = [8, 32], strides = [1, 1]} : vector<8x64xf32> to vector<8x32xf32>
    %23 = vector.extract_strided_slice %15 {offsets = [0, 0], sizes = [8, 8], strides = [1, 1]} : vector<8x32xf32> to vector<8x8xf32>
    %24 = arith.truncf %23 : vector<8x8xf32> to vector<8x8xbf16>
    %25 = vector.extract_strided_slice %21 {offsets = [0, 0], sizes = [8, 8], strides = [1, 1]} : vector<8x32xf32> to vector<8x8xf32>
    %26 = arith.truncf %25 : vector<8x8xf32> to vector<8x8xbf16>
    %27 = vector.extract_strided_slice %22 {offsets = [0, 0], sizes = [8, 8], strides = [1, 1]} : vector<8x32xf32> to vector<8x8xf32>
    %28 = arith.truncf %27 : vector<8x8xf32> to vector<8x8xbf16>
    %cst_18 = arith.constant dense<0.000000e+00> : vector<8x8xf32>
    %29 = tpu.matmul %24, %26, %cst_18 {dimension_numbers = #tpu.dot_dimension_numbers<[1], [1], [0], [0], [0, 0, 1, 0], [], []>} : vector<8x8xbf16>, vector<8x8xbf16>, vector<8x8xf32> -> vector<8x8xf32>
    %cst_19 = arith.constant -1.000000e+09 : f32
    %30 = vector.broadcast %cst_19 : f32 to vector<8x8xf32>
    %31 = arith.select %10, %29, %30 : vector<8x8xi1>, vector<8x8xf32>
    %cst_20 = arith.constant dense<0xFF800000> : vector<8xf32>
    %32 = vector.multi_reduction <maximumf>, %31, %cst_20 [1] : vector<8x8xf32> to vector<8xf32>
    %33 = vector.shape_cast %32 : vector<8xf32> to vector<8x1xf32>
    %34 = vector.broadcast %33 : vector<8x1xf32> to vector<8x8xf32>
    %35 = arith.subf %31, %34 : vector<8x8xf32>
    %36 = math.exp %35 : vector<8x8xf32>
    %cst_21 = arith.constant dense<0.000000e+00> : vector<8xf32>
    %37 = vector.multi_reduction <add>, %36, %cst_21 [1] : vector<8x8xf32> to vector<8xf32>
    %38 = vector.shape_cast %37 : vector<8xf32> to vector<8x1xf32>
    %39 = tpu.reciprocal %38 {approx = true} : vector<8x1xf32> -> vector<8x1xf32>
    %40 = arith.mulf %38, %39 : vector<8x1xf32>
    %cst_22 = arith.constant 2.000000e+00 : f32
    %41 = vector.broadcast %cst_22 : f32 to vector<8x1xf32>
    %42 = arith.subf %41, %40 : vector<8x1xf32>
    %43 = arith.mulf %39, %42 : vector<8x1xf32>
    %44 = vector.broadcast %43 : vector<8x1xf32> to vector<8x8xf32>
    %45 = arith.mulf %36, %44 : vector<8x8xf32>
    %46 = arith.truncf %45 : vector<8x8xf32> to vector<8x8xbf16>
    %cst_23 = arith.constant dense<0.000000e+00> : vector<8x8xf32>
    %47 = tpu.matmul %46, %28, %cst_23 {dimension_numbers = #tpu.dot_dimension_numbers<[1], [0], [0], [1], [0, 0, 1, 1], [], []>} : vector<8x8xbf16>, vector<8x8xbf16>, vector<8x8xf32> -> vector<8x8xf32>
    %c0_24 = arith.constant 0 : index
    %c0_25 = arith.constant 0 : index
    %48 = vector.load %arg13[%c0_24, %c0_25] : memref<8x32xf32, #tpu.memory_space<vmem>>, vector<8x8xf32>
    tpu.vector_store %arg13[%c0_24, %c0_25], %47 {strides = array<i32>} : memref<8x32xf32, #tpu.memory_space<vmem>>, vector<8x8xf32>,
    %49 = vector.extract_strided_slice %15 {offsets = [0, 8], sizes = [8, 8], strides = [1, 1]} : vector<8x32xf32> to vector<8x8xf32>
    %50 = arith.truncf %49 : vector<8x8xf32> to vector<8x8xbf16>
    %51 = vector.extract_strided_slice %21 {offsets = [0, 8], sizes = [8, 8], strides = [1, 1]} : vector<8x32xf32> to vector<8x8xf32>
    %52 = arith.truncf %51 : vector<8x8xf32> to vector<8x8xbf16>
    %53 = vector.extract_strided_slice %22 {offsets = [0, 8], sizes = [8, 8], strides = [1, 1]} : vector<8x32xf32> to vector<8x8xf32>
    %54 = arith.truncf %53 : vector<8x8xf32> to vector<8x8xbf16>
    %cst_26 = arith.constant dense<0.000000e+00> : vector<8x8xf32>
    %55 = tpu.matmul %50, %52, %cst_26 {dimension_numbers = #tpu.dot_dimension_numbers<[1], [1], [0], [0], [0, 0, 1, 0], [], []>} : vector<8x8xbf16>, vector<8x8xbf16>, vector<8x8xf32> -> vector<8x8xf32>
    %cst_27 = arith.constant -1.000000e+09 : f32
    %56 = vector.broadcast %cst_27 : f32 to vector<8x8xf32>
    %57 = arith.select %10, %55, %56 : vector<8x8xi1>, vector<8x8xf32>
    %cst_28 = arith.constant dense<0xFF800000> : vector<8xf32>
    %58 = vector.multi_reduction <maximumf>, %57, %cst_28 [1] : vector<8x8xf32> to vector<8xf32>
    %59 = vector.shape_cast %58 : vector<8xf32> to vector<8x1xf32>
    %60 = vector.broadcast %59 : vector<8x1xf32> to vector<8x8xf32>
    %61 = arith.subf %57, %60 : vector<8x8xf32>
    %62 = math.exp %61 : vector<8x8xf32>
    %cst_29 = arith.constant dense<0.000000e+00> : vector<8xf32>
    %63 = vector.multi_reduction <add>, %62, %cst_29 [1] : vector<8x8xf32> to vector<8xf32>
    %64 = vector.shape_cast %63 : vector<8xf32> to vector<8x1xf32>
    %65 = tpu.reciprocal %64 {approx = true} : vector<8x1xf32> -> vector<8x1xf32>
    %66 = arith.mulf %64, %65 : vector<8x1xf32>
    %cst_30 = arith.constant 2.000000e+00 : f32
    %67 = vector.broadcast %cst_30 : f32 to vector<8x1xf32>
    %68 = arith.subf %67, %66 : vector<8x1xf32>
    %69 = arith.mulf %65, %68 : vector<8x1xf32>
    %70 = vector.broadcast %69 : vector<8x1xf32> to vector<8x8xf32>
    %71 = arith.mulf %62, %70 : vector<8x8xf32>
    %72 = arith.truncf %71 : vector<8x8xf32> to vector<8x8xbf16>
    %cst_31 = arith.constant dense<0.000000e+00> : vector<8x8xf32>
    %73 = tpu.matmul %72, %54, %cst_31 {dimension_numbers = #tpu.dot_dimension_numbers<[1], [0], [0], [1], [0, 0, 1, 1], [], []>} : vector<8x8xbf16>, vector<8x8xbf16>, vector<8x8xf32> -> vector<8x8xf32>
    %c0_32 = arith.constant 0 : index
    %c8 = arith.constant 8 : index
    %74 = vector.load %arg13[%c0_32, %c8] : memref<8x32xf32, #tpu.memory_space<vmem>>, vector<8x8xf32>
    tpu.vector_store %arg13[%c0_32, %c8], %73 {strides = array<i32>} : memref<8x32xf32, #tpu.memory_space<vmem>>, vector<8x8xf32>,
    %75 = vector.extract_strided_slice %15 {offsets = [0, 16], sizes = [8, 8], strides = [1, 1]} : vector<8x32xf32> to vector<8x8xf32>
    %76 = arith.truncf %75 : vector<8x8xf32> to vector<8x8xbf16>
    %77 = vector.extract_strided_slice %21 {offsets = [0, 16], sizes = [8, 8], strides = [1, 1]} : vector<8x32xf32> to vector<8x8xf32>
    %78 = arith.truncf %77 : vector<8x8xf32> to vector<8x8xbf16>
    %79 = vector.extract_strided_slice %22 {offsets = [0, 16], sizes = [8, 8], strides = [1, 1]} : vector<8x32xf32> to vector<8x8xf32>
    %80 = arith.truncf %79 : vector<8x8xf32> to vector<8x8xbf16>
    %cst_33 = arith.constant dense<0.000000e+00> : vector<8x8xf32>
    %81 = tpu.matmul %76, %78, %cst_33 {dimension_numbers = #tpu.dot_dimension_numbers<[1], [1], [0], [0], [0, 0, 1, 0], [], []>} : vector<8x8xbf16>, vector<8x8xbf16>, vector<8x8xf32> -> vector<8x8xf32>
    %cst_34 = arith.constant -1.000000e+09 : f32
    %82 = vector.broadcast %cst_34 : f32 to vector<8x8xf32>
    %83 = arith.select %10, %81, %82 : vector<8x8xi1>, vector<8x8xf32>
    %cst_35 = arith.constant dense<0xFF800000> : vector<8xf32>
    %84 = vector.multi_reduction <maximumf>, %83, %cst_35 [1] : vector<8x8xf32> to vector<8xf32>
    %85 = vector.shape_cast %84 : vector<8xf32> to vector<8x1xf32>
    %86 = vector.broadcast %85 : vector<8x1xf32> to vector<8x8xf32>
    %87 = arith.subf %83, %86 : vector<8x8xf32>
    %88 = math.exp %87 : vector<8x8xf32>
    %cst_36 = arith.constant dense<0.000000e+00> : vector<8xf32>
    %89 = vector.multi_reduction <add>, %88, %cst_36 [1] : vector<8x8xf32> to vector<8xf32>
    %90 = vector.shape_cast %89 : vector<8xf32> to vector<8x1xf32>
    %91 = tpu.reciprocal %90 {approx = true} : vector<8x1xf32> -> vector<8x1xf32>
    %92 = arith.mulf %90, %91 : vector<8x1xf32>
    %cst_37 = arith.constant 2.000000e+00 : f32
    %93 = vector.broadcast %cst_37 : f32 to vector<8x1xf32>
    %94 = arith.subf %93, %92 : vector<8x1xf32>
    %95 = arith.mulf %91, %94 : vector<8x1xf32>
    %96 = vector.broadcast %95 : vector<8x1xf32> to vector<8x8xf32>
    %97 = arith.mulf %88, %96 : vector<8x8xf32>
    %98 = arith.truncf %97 : vector<8x8xf32> to vector<8x8xbf16>
    %cst_38 = arith.constant dense<0.000000e+00> : vector<8x8xf32>
    %99 = tpu.matmul %98, %80, %cst_38 {dimension_numbers = #tpu.dot_dimension_numbers<[1], [0], [0], [1], [0, 0, 1, 1], [], []>} : vector<8x8xbf16>, vector<8x8xbf16>, vector<8x8xf32> -> vector<8x8xf32>
    %c0_39 = arith.constant 0 : index
    %c16 = arith.constant 16 : index
    %100 = vector.load %arg13[%c0_39, %c16] : memref<8x32xf32, #tpu.memory_space<vmem>>, vector<8x8xf32>
    tpu.vector_store %arg13[%c0_39, %c16], %99 {strides = array<i32>} : memref<8x32xf32, #tpu.memory_space<vmem>>, vector<8x8xf32>,
    %101 = vector.extract_strided_slice %15 {offsets = [0, 24], sizes = [8, 8], strides = [1, 1]} : vector<8x32xf32> to vector<8x8xf32>
    %102 = arith.truncf %101 : vector<8x8xf32> to vector<8x8xbf16>
    %103 = vector.extract_strided_slice %21 {offsets = [0, 24], sizes = [8, 8], strides = [1, 1]} : vector<8x32xf32> to vector<8x8xf32>
    %104 = arith.truncf %103 : vector<8x8xf32> to vector<8x8xbf16>
    %105 = vector.extract_strided_slice %22 {offsets = [0, 24], sizes = [8, 8], strides = [1, 1]} : vector<8x32xf32> to vector<8x8xf32>
    %106 = arith.truncf %105 : vector<8x8xf32> to vector<8x8xbf16>
    %cst_40 = arith.constant dense<0.000000e+00> : vector<8x8xf32>
    %107 = tpu.matmul %102, %104, %cst_40 {dimension_numbers = #tpu.dot_dimension_numbers<[1], [1], [0], [0], [0, 0, 1, 0], [], []>} : vector<8x8xbf16>, vector<8x8xbf16>, vector<8x8xf32> -> vector<8x8xf32>
    %cst_41 = arith.constant -1.000000e+09 : f32
    %108 = vector.broadcast %cst_41 : f32 to vector<8x8xf32>
    %109 = arith.select %10, %107, %108 : vector<8x8xi1>, vector<8x8xf32>
    %cst_42 = arith.constant dense<0xFF800000> : vector<8xf32>
    %110 = vector.multi_reduction <maximumf>, %109, %cst_42 [1] : vector<8x8xf32> to vector<8xf32>
    %111 = vector.shape_cast %110 : vector<8xf32> to vector<8x1xf32>
    %112 = vector.broadcast %111 : vector<8x1xf32> to vector<8x8xf32>
    %113 = arith.subf %109, %112 : vector<8x8xf32>
    %114 = math.exp %113 : vector<8x8xf32>
    %cst_43 = arith.constant dense<0.000000e+00> : vector<8xf32>
    %115 = vector.multi_reduction <add>, %114, %cst_43 [1] : vector<8x8xf32> to vector<8xf32>
    %116 = vector.shape_cast %115 : vector<8xf32> to vector<8x1xf32>
    %117 = tpu.reciprocal %116 {approx = true} : vector<8x1xf32> -> vector<8x1xf32>
    %118 = arith.mulf %116, %117 : vector<8x1xf32>
    %cst_44 = arith.constant 2.000000e+00 : f32
    %119 = vector.broadcast %cst_44 : f32 to vector<8x1xf32>
    %120 = arith.subf %119, %118 : vector<8x1xf32>
    %121 = arith.mulf %117, %120 : vector<8x1xf32>
    %122 = vector.broadcast %121 : vector<8x1xf32> to vector<8x8xf32>
    %123 = arith.mulf %114, %122 : vector<8x8xf32>
    %124 = arith.truncf %123 : vector<8x8xf32> to vector<8x8xbf16>
    %cst_45 = arith.constant dense<0.000000e+00> : vector<8x8xf32>
    %125 = tpu.matmul %124, %106, %cst_45 {dimension_numbers = #tpu.dot_dimension_numbers<[1], [0], [0], [1], [0, 0, 1, 1], [], []>} : vector<8x8xbf16>, vector<8x8xbf16>, vector<8x8xf32> -> vector<8x8xf32>
    %c0_46 = arith.constant 0 : index
    %c24 = arith.constant 24 : index
    %126 = vector.load %arg13[%c0_46, %c24] : memref<8x32xf32, #tpu.memory_space<vmem>>, vector<8x8xf32>
    tpu.vector_store %arg13[%c0_46, %c24], %125 {strides = array<i32>} : memref<8x32xf32, #tpu.memory_space<vmem>>, vector<8x8xf32>,
    %c0_47 = arith.constant 0 : index
    %c0_48 = arith.constant 0 : index
    %127 = vector.load %arg13[%c0_47, %c0_48] : memref<8x32xf32, #tpu.memory_space<vmem>>, vector<8x32xf32>
    %128 = arith.truncf %127 : vector<8x32xf32> to vector<8x32xbf16>
    %c0_49 = arith.constant 0 : index
    %c0_50 = arith.constant 0 : index
    %129 = vector.load %arg8[%c0_49, %c0_50] : memref<32x32xbf16, #tpu.memory_space<vmem>>, vector<32x32xbf16>
    %cst_51 = arith.constant dense<0.000000e+00> : vector<8x32xf32>
    %130 = tpu.matmul %128, %129, %cst_51 {dimension_numbers = #tpu.dot_dimension_numbers<[1], [0], [0], [1], [0, 0, 1, 1], [], []>} : vector<8x32xbf16>, vector<32x32xbf16>, vector<8x32xf32> -> vector<8x32xf32>
    %c0_52 = arith.constant 0 : index
    %c0_53 = arith.constant 0 : index
    %131 = vector.load %arg9[%c0_52, %c0_53] : memref<1x32xf32, #tpu.memory_space<vmem>>, vector<1x32xf32>
    %132 = vector.broadcast %131 : vector<1x32xf32> to vector<8x32xf32>
    %133 = arith.addf %130, %132 : vector<8x32xf32>
    %134 = arith.addf %133, %1 : vector<8x32xf32>
    %cst_54 = arith.constant dense<0.000000e+00> : vector<8xf32>
    %135 = vector.multi_reduction <add>, %134, %cst_54 [1] : vector<8x32xf32> to vector<8xf32>
    %136 = vector.shape_cast %135 : vector<8xf32> to vector<8x1xf32>
    %cst_55 = arith.constant 3.200000e+01 : f32
    %137 = vector.broadcast %cst_55 : f32 to vector<8x1xf32>
    %138 = arith.divf %136, %137 : vector<8x1xf32>
    %139 = vector.broadcast %138 : vector<8x1xf32> to vector<8x32xf32>
    %140 = arith.subf %134, %139 : vector<8x32xf32>
    %141 = arith.mulf %140, %140 : vector<8x32xf32>
    %cst_56 = arith.constant dense<0.000000e+00> : vector<8xf32>
    %142 = vector.multi_reduction <add>, %141, %cst_56 [1] : vector<8x32xf32> to vector<8xf32>
    %143 = vector.shape_cast %142 : vector<8xf32> to vector<8x1xf32>
    %cst_57 = arith.constant 3.200000e+01 : f32
    %144 = vector.broadcast %cst_57 : f32 to vector<8x1xf32>
    %145 = arith.divf %143, %144 : vector<8x1xf32>
    %146 = vector.broadcast %138 : vector<8x1xf32> to vector<8x32xf32>
    %147 = arith.subf %134, %146 : vector<8x32xf32>
    %cst_58 = arith.constant 9.99999997E-7 : f32
    %148 = vector.broadcast %cst_58 : f32 to vector<8x1xf32>
    %149 = arith.addf %145, %148 : vector<8x1xf32>
    %150 = math.rsqrt %149 : vector<8x1xf32>
    %151 = vector.broadcast %150 : vector<8x1xf32> to vector<8x32xf32>
    %152 = arith.mulf %147, %151 : vector<8x32xf32>
    %c0_59 = arith.constant 0 : index
    %c0_60 = arith.constant 0 : index
    %153 = vector.load %arg10[%c0_59, %c0_60] : memref<1x32xf32, #tpu.memory_space<vmem>>, vector<1x32xf32>
    %154 = vector.broadcast %153 : vector<1x32xf32> to vector<8x32xf32>
    %155 = arith.mulf %152, %154 : vector<8x32xf32>
    %c0_61 = arith.constant 0 : index
    %c0_62 = arith.constant 0 : index
    %156 = vector.load %arg11[%c0_61, %c0_62] : memref<1x32xf32, #tpu.memory_space<vmem>>, vector<1x32xf32>
    %157 = vector.broadcast %156 : vector<1x32xf32> to vector<8x32xf32>
    %158 = arith.addf %155, %157 : vector<8x32xf32>
    %c0_63 = arith.constant 0 : index
    %c0_64 = arith.constant 0 : index
    %c0_65 = arith.constant 0 : index
    %159 = vector.load %arg12[%c0_63, %c0_64, %c0_65] : memref<1x8x32xf32, #tpu.memory_space<vmem>>, vector<1x8x32xf32>
    %160 = vector.shape_cast %159 : vector<1x8x32xf32> to vector<8x32xf32>
    %161 = vector.shape_cast %158 : vector<8x32xf32> to vector<1x8x32xf32>
    tpu.vector_store %arg12[%c0_63, %c0_64, %c0_65], %161 {strides = array<i32>} : memref<1x8x32xf32, #tpu.memory_space<vmem>>, vector<1x8x32xf32>,
    return
  }
  func.func @transform_0(%arg0: i32) -> (i32, i32, i32) {
    %c0_i32 = arith.constant 0 : i32
    %c0_i32_0 = arith.constant 0 : i32
    %c0_i32_1 = arith.constant 0 : i32
    return %arg0, %c0_i32, %c0_i32_0 : i32, i32, i32
  }
  func.func @transform_1(%arg0: i32) -> (i32, i32, i32) {
    %c0_i32 = arith.constant 0 : i32
    %c0_i32_0 = arith.constant 0 : i32
    %c0_i32_1 = arith.constant 0 : i32
    return %arg0, %c0_i32, %c0_i32_0 : i32, i32, i32
  }
  func.func @transform_2(%arg0: i32) -> (i32, i32, i32) {
    %c0_i32 = arith.constant 0 : i32
    %c0_i32_0 = arith.constant 0 : i32
    %c0_i32_1 = arith.constant 0 : i32
    return %arg0, %c0_i32, %c0_i32_0 : i32, i32, i32
  }
  func.func @transform_3(%arg0: i32) -> (i32, i32) {
    %c0_i32 = arith.constant 0 : i32
    %c0_i32_0 = arith.constant 0 : i32
    %c0_i32_1 = arith.constant 0 : i32
    return %c0_i32, %c0_i32_0 : i32, i32
  }
  func.func @transform_4(%arg0: i32) -> (i32, i32) {
    %c0_i32 = arith.constant 0 : i32
    %c0_i32_0 = arith.constant 0 : i32
    %c0_i32_1 = arith.constant 0 : i32
    return %c0_i32, %c0_i32_0 : i32, i32
  }
  func.func @transform_5(%arg0: i32) -> (i32, i32) {
    %c0_i32 = arith.constant 0 : i32
    %c0_i32_0 = arith.constant 0 : i32
    %c0_i32_1 = arith.constant 0 : i32
    return %c0_i32, %c0_i32_0 : i32, i32
  }
  func.func @transform_6(%arg0: i32) -> (i32, i32) {
    %c0_i32 = arith.constant 0 : i32
    %c0_i32_0 = arith.constant 0 : i32
    %c0_i32_1 = arith.constant 0 : i32
    return %c0_i32, %c0_i32_0 : i32, i32
  }
  func.func @transform_7(%arg0: i32) -> (i32, i32) {
    %c0_i32 = arith.constant 0 : i32
    %c0_i32_0 = arith.constant 0 : i32
    %c0_i32_1 = arith.constant 0 : i32
    return %c0_i32, %c0_i32_0 : i32, i32
  }
  func.func @transform_8(%arg0: i32) -> (i32, i32) {
    %c0_i32 = arith.constant 0 : i32
    %c0_i32_0 = arith.constant 0 : i32
    %c0_i32_1 = arith.constant 0 : i32
    return %c0_i32, %c0_i32_0 : i32, i32
  }
  func.func @transform_9(%arg0: i32) -> (i32, i32) {
    %c0_i32 = arith.constant 0 : i32
    %c0_i32_0 = arith.constant 0 : i32
    %c0_i32_1 = arith.constant 0 : i32
    return %c0_i32, %c0_i32_0 : i32, i32
  }
  func.func @transform_10(%arg0: i32) -> (i32, i32) {
    %c0_i32 = arith.constant 0 : i32
    %c0_i32_0 = arith.constant 0 : i32
    %c0_i32_1 = arith.constant 0 : i32
    return %c0_i32, %c0_i32_0 : i32, i32
  }
  func.func @transform_11(%arg0: i32) -> (i32, i32, i32) {
    %c0_i32 = arith.constant 0 : i32
    %c0_i32_0 = arith.constant 0 : i32
    %c0_i32_1 = arith.constant 0 : i32
    return %arg0, %c0_i32, %c0_i32_0 : i32, i32, i32
  }
}

module attributes {stable_mosaic.version = 11 : i64} {
  func.func @_mha_addln_kernel(%arg0: i32, %arg1: memref<1x8x32xf32, #tpu.memory_space<vmem>>, %arg2: memref<1x10x32xf32, #tpu.memory_space<vmem>>, %arg3: memref<1x8x10xi8, #tpu.memory_space<vmem>>, %arg4: memref<32x32xbf16, #tpu.memory_space<vmem>>, %arg5: memref<1x32xf32, #tpu.memory_space<vmem>>, %arg6: memref<32x64xbf16, #tpu.memory_space<vmem>>, %arg7: memref<1x64xf32, #tpu.memory_space<vmem>>, %arg8: memref<32x32xbf16, #tpu.memory_space<vmem>>, %arg9: memref<1x32xf32, #tpu.memory_space<vmem>>, %arg10: memref<1x32xf32, #tpu.memory_space<vmem>>, %arg11: memref<1x32xf32, #tpu.memory_space<vmem>>, %arg12: memref<1x8x32xf32, #tpu.memory_space<vmem>>, %arg13: memref<8x32xf32, #tpu.memory_space<vmem>>) attributes {dimension_semantics = [#tpu.dimension_semantics<parallel>], iteration_bounds = array<i64: 2>, scalar_prefetch = 0 : i64, scratch_operands = 1 : i64, tpu.core_type = #tpu.core_type<tc>, window_params = [{transform_indices = @transform_0, window_bounds = array<i64: 1, 8, 32>}, {transform_indices = @transform_1, window_bounds = array<i64: 1, 10, 32>}, {transform_indices = @transform_2, window_bounds = array<i64: 1, 8, 10>}, {pipeline_mode = #tpu.pipeline_mode<synchronous>, transform_indices = @transform_3, window_bounds = array<i64: 32, 32>}, {pipeline_mode = #tpu.pipeline_mode<synchronous>, transform_indices = @transform_4, window_bounds = array<i64: 1, 32>}, {pipeline_mode = #tpu.pipeline_mode<synchronous>, transform_indices = @transform_5, window_bounds = array<i64: 32, 64>}, {pipeline_mode = #tpu.pipeline_mode<synchronous>, transform_indices = @transform_6, window_bounds = array<i64: 1, 64>}, {pipeline_mode = #tpu.pipeline_mode<synchronous>, transform_indices = @transform_7, window_bounds = array<i64: 32, 32>}, {pipeline_mode = #tpu.pipeline_mode<synchronous>, transform_indices = @transform_8, window_bounds = array<i64: 1, 32>}, {pipeline_mode = #tpu.pipeline_mode<synchronous>, transform_indices = @transform_9, window_bounds = array<i64: 1, 32>}, {pipeline_mode = #tpu.pipeline_mode<synchronous>, transform_indices = @transform_10, window_bounds = array<i64: 1, 32>}, {transform_indices = @transform_11, window_bounds = array<i64: 1, 8, 32>}]} {
    %c0 = arith.constant 0 : index
    %c0_0 = arith.constant 0 : index
    %c0_1 = arith.constant 0 : index
    %0 = vector.load %arg1[%c0, %c0_0, %c0_1] : memref<1x8x32xf32, #tpu.memory_space<vmem>>, vector<1x8x32xf32>
    %1 = vector.shape_cast %0 : vector<1x8x32xf32> to vector<8x32xf32>
    %2 = arith.truncf %1 : vector<8x32xf32> to vector<8x32xbf16>
    %c0_2 = arith.constant 0 : index
    %c0_3 = arith.constant 0 : index
    %c0_4 = arith.constant 0 : index
    %3 = vector.load %arg2[%c0_2, %c0_3, %c0_4] : memref<1x10x32xf32, #tpu.memory_space<vmem>>, vector<1x10x32xf32>
    %4 = vector.shape_cast %3 : vector<1x10x32xf32> to vector<10x32xf32>
    %5 = arith.truncf %4 : vector<10x32xf32> to vector<10x32xbf16>
    %c0_5 = arith.constant 0 : index
    %c0_6 = arith.constant 0 : index
    %c0_7 = arith.constant 0 : index
    %6 = vector.load %arg3[%c0_5, %c0_6, %c0_7] : memref<1x8x10xi8, #tpu.memory_space<vmem>>, vector<1x8x10xi8>
    %7 = vector.shape_cast %6 : vector<1x8x10xi8> to vector<8x10xi8>
    %8 = arith.sitofp %7 : vector<8x10xi8> to vector<8x10xf32>
    %cst = arith.constant 0.000000e+00 : f32
    %9 = vector.broadcast %cst : f32 to vector<8x10xf32>
    %10 = arith.cmpf ogt, %8, %9 : vector<8x10xf32>
    %c0_8 = arith.constant 0 : index
    %c0_9 = arith.constant 0 : index
    %11 = vector.load %arg4[%c0_8, %c0_9] : memref<32x32xbf16, #tpu.memory_space<vmem>>, vector<32x32xbf16>
    %cst_10 = arith.constant dense<0.000000e+00> : vector<8x32xf32>
    %12 = tpu.matmul %2, %11, %cst_10 {dimension_numbers = #tpu.dot_dimension_numbers<[1], [0], [0], [1], [0, 0, 1, 1], [], []>} : vector<8x32xbf16>, vector<32x32xbf16>, vector<8x32xf32> -> vector<8x32xf32>
    %c0_11 = arith.constant 0 : index
    %c0_12 = arith.constant 0 : index
    %13 = vector.load %arg5[%c0_11, %c0_12] : memref<1x32xf32, #tpu.memory_space<vmem>>, vector<1x32xf32>
    %14 = vector.broadcast %13 : vector<1x32xf32> to vector<8x32xf32>
    %15 = arith.addf %12, %14 : vector<8x32xf32>
    %c0_13 = arith.constant 0 : index
    %c0_14 = arith.constant 0 : index
    %16 = vector.load %arg6[%c0_13, %c0_14] : memref<32x64xbf16, #tpu.memory_space<vmem>>, vector<32x64xbf16>
    %cst_15 = arith.constant dense<0.000000e+00> : vector<10x64xf32>
    %17 = tpu.matmul %5, %16, %cst_15 {dimension_numbers = #tpu.dot_dimension_numbers<[1], [0], [0], [1], [0, 0, 1, 1], [], []>} : vector<10x32xbf16>, vector<32x64xbf16>, vector<10x64xf32> -> vector<10x64xf32>
    %c0_16 = arith.constant 0 : index
    %c0_17 = arith.constant 0 : index
    %18 = vector.load %arg7[%c0_16, %c0_17] : memref<1x64xf32, #tpu.memory_space<vmem>>, vector<1x64xf32>
    %19 = vector.broadcast %18 : vector<1x64xf32> to vector<10x64xf32>
    %20 = arith.addf %17, %19 : vector<10x64xf32>
    %21 = vector.extract_strided_slice %20 {offsets = [0, 0], sizes = [10, 32], strides = [1, 1]} : vector<10x64xf32> to vector<10x32xf32>
    %22 = vector.extract_strided_slice %20 {offsets = [0, 32], sizes = [10, 32], strides = [1, 1]} : vector<10x64xf32> to vector<10x32xf32>
    %23 = vector.extract_strided_slice %15 {offsets = [0, 0], sizes = [8, 8], strides = [1, 1]} : vector<8x32xf32> to vector<8x8xf32>
    %24 = arith.truncf %23 : vector<8x8xf32> to vector<8x8xbf16>
    %25 = vector.extract_strided_slice %21 {offsets = [0, 0], sizes = [10, 8], strides = [1, 1]} : vector<10x32xf32> to vector<10x8xf32>
    %26 = arith.truncf %25 : vector<10x8xf32> to vector<10x8xbf16>
    %27 = vector.extract_strided_slice %22 {offsets = [0, 0], sizes = [10, 8], strides = [1, 1]} : vector<10x32xf32> to vector<10x8xf32>
    %28 = arith.truncf %27 : vector<10x8xf32> to vector<10x8xbf16>
    %cst_18 = arith.constant dense<0.000000e+00> : vector<8x10xf32>
    %29 = tpu.matmul %24, %26, %cst_18 {dimension_numbers = #tpu.dot_dimension_numbers<[1], [1], [0], [0], [0, 0, 1, 0], [], []>} : vector<8x8xbf16>, vector<10x8xbf16>, vector<8x10xf32> -> vector<8x10xf32>
    %cst_19 = arith.constant -1.000000e+09 : f32
    %30 = vector.broadcast %cst_19 : f32 to vector<8x10xf32>
    %31 = arith.select %10, %29, %30 : vector<8x10xi1>, vector<8x10xf32>
    %cst_20 = arith.constant dense<0xFF800000> : vector<8xf32>
    %32 = vector.multi_reduction <maximumf>, %31, %cst_20 [1] : vector<8x10xf32> to vector<8xf32>
    %33 = vector.shape_cast %32 : vector<8xf32> to vector<8x1xf32>
    %34 = vector.broadcast %33 : vector<8x1xf32> to vector<8x10xf32>
    %35 = arith.subf %31, %34 : vector<8x10xf32>
    %36 = math.exp %35 : vector<8x10xf32>
    %cst_21 = arith.constant dense<0.000000e+00> : vector<8xf32>
    %37 = vector.multi_reduction <add>, %36, %cst_21 [1] : vector<8x10xf32> to vector<8xf32>
    %38 = vector.shape_cast %37 : vector<8xf32> to vector<8x1xf32>
    %39 = tpu.reciprocal %38 {approx = true} : vector<8x1xf32> -> vector<8x1xf32>
    %40 = arith.mulf %38, %39 : vector<8x1xf32>
    %cst_22 = arith.constant 2.000000e+00 : f32
    %41 = vector.broadcast %cst_22 : f32 to vector<8x1xf32>
    %42 = arith.subf %41, %40 : vector<8x1xf32>
    %43 = arith.mulf %39, %42 : vector<8x1xf32>
    %44 = vector.broadcast %43 : vector<8x1xf32> to vector<8x10xf32>
    %45 = arith.mulf %36, %44 : vector<8x10xf32>
    %46 = arith.truncf %45 : vector<8x10xf32> to vector<8x10xbf16>
    %cst_23 = arith.constant dense<0.000000e+00> : vector<8x8xf32>
    %47 = tpu.matmul %46, %28, %cst_23 {dimension_numbers = #tpu.dot_dimension_numbers<[1], [0], [0], [1], [0, 0, 1, 1], [], []>} : vector<8x10xbf16>, vector<10x8xbf16>, vector<8x8xf32> -> vector<8x8xf32>
    %c0_24 = arith.constant 0 : index
    %c0_25 = arith.constant 0 : index
    %48 = vector.load %arg13[%c0_24, %c0_25] : memref<8x32xf32, #tpu.memory_space<vmem>>, vector<8x8xf32>
    tpu.vector_store %arg13[%c0_24, %c0_25], %47 {strides = array<i32>} : memref<8x32xf32, #tpu.memory_space<vmem>>, vector<8x8xf32>,
    %49 = vector.extract_strided_slice %15 {offsets = [0, 8], sizes = [8, 8], strides = [1, 1]} : vector<8x32xf32> to vector<8x8xf32>
    %50 = arith.truncf %49 : vector<8x8xf32> to vector<8x8xbf16>
    %51 = vector.extract_strided_slice %21 {offsets = [0, 8], sizes = [10, 8], strides = [1, 1]} : vector<10x32xf32> to vector<10x8xf32>
    %52 = arith.truncf %51 : vector<10x8xf32> to vector<10x8xbf16>
    %53 = vector.extract_strided_slice %22 {offsets = [0, 8], sizes = [10, 8], strides = [1, 1]} : vector<10x32xf32> to vector<10x8xf32>
    %54 = arith.truncf %53 : vector<10x8xf32> to vector<10x8xbf16>
    %cst_26 = arith.constant dense<0.000000e+00> : vector<8x10xf32>
    %55 = tpu.matmul %50, %52, %cst_26 {dimension_numbers = #tpu.dot_dimension_numbers<[1], [1], [0], [0], [0, 0, 1, 0], [], []>} : vector<8x8xbf16>, vector<10x8xbf16>, vector<8x10xf32> -> vector<8x10xf32>
    %cst_27 = arith.constant -1.000000e+09 : f32
    %56 = vector.broadcast %cst_27 : f32 to vector<8x10xf32>
    %57 = arith.select %10, %55, %56 : vector<8x10xi1>, vector<8x10xf32>
    %cst_28 = arith.constant dense<0xFF800000> : vector<8xf32>
    %58 = vector.multi_reduction <maximumf>, %57, %cst_28 [1] : vector<8x10xf32> to vector<8xf32>
    %59 = vector.shape_cast %58 : vector<8xf32> to vector<8x1xf32>
    %60 = vector.broadcast %59 : vector<8x1xf32> to vector<8x10xf32>
    %61 = arith.subf %57, %60 : vector<8x10xf32>
    %62 = math.exp %61 : vector<8x10xf32>
    %cst_29 = arith.constant dense<0.000000e+00> : vector<8xf32>
    %63 = vector.multi_reduction <add>, %62, %cst_29 [1] : vector<8x10xf32> to vector<8xf32>
    %64 = vector.shape_cast %63 : vector<8xf32> to vector<8x1xf32>
    %65 = tpu.reciprocal %64 {approx = true} : vector<8x1xf32> -> vector<8x1xf32>
    %66 = arith.mulf %64, %65 : vector<8x1xf32>
    %cst_30 = arith.constant 2.000000e+00 : f32
    %67 = vector.broadcast %cst_30 : f32 to vector<8x1xf32>
    %68 = arith.subf %67, %66 : vector<8x1xf32>
    %69 = arith.mulf %65, %68 : vector<8x1xf32>
    %70 = vector.broadcast %69 : vector<8x1xf32> to vector<8x10xf32>
    %71 = arith.mulf %62, %70 : vector<8x10xf32>
    %72 = arith.truncf %71 : vector<8x10xf32> to vector<8x10xbf16>
    %cst_31 = arith.constant dense<0.000000e+00> : vector<8x8xf32>
    %73 = tpu.matmul %72, %54, %cst_31 {dimension_numbers = #tpu.dot_dimension_numbers<[1], [0], [0], [1], [0, 0, 1, 1], [], []>} : vector<8x10xbf16>, vector<10x8xbf16>, vector<8x8xf32> -> vector<8x8xf32>
    %c0_32 = arith.constant 0 : index
    %c8 = arith.constant 8 : index
    %74 = vector.load %arg13[%c0_32, %c8] : memref<8x32xf32, #tpu.memory_space<vmem>>, vector<8x8xf32>
    tpu.vector_store %arg13[%c0_32, %c8], %73 {strides = array<i32>} : memref<8x32xf32, #tpu.memory_space<vmem>>, vector<8x8xf32>,
    %75 = vector.extract_strided_slice %15 {offsets = [0, 16], sizes = [8, 8], strides = [1, 1]} : vector<8x32xf32> to vector<8x8xf32>
    %76 = arith.truncf %75 : vector<8x8xf32> to vector<8x8xbf16>
    %77 = vector.extract_strided_slice %21 {offsets = [0, 16], sizes = [10, 8], strides = [1, 1]} : vector<10x32xf32> to vector<10x8xf32>
    %78 = arith.truncf %77 : vector<10x8xf32> to vector<10x8xbf16>
    %79 = vector.extract_strided_slice %22 {offsets = [0, 16], sizes = [10, 8], strides = [1, 1]} : vector<10x32xf32> to vector<10x8xf32>
    %80 = arith.truncf %79 : vector<10x8xf32> to vector<10x8xbf16>
    %cst_33 = arith.constant dense<0.000000e+00> : vector<8x10xf32>
    %81 = tpu.matmul %76, %78, %cst_33 {dimension_numbers = #tpu.dot_dimension_numbers<[1], [1], [0], [0], [0, 0, 1, 0], [], []>} : vector<8x8xbf16>, vector<10x8xbf16>, vector<8x10xf32> -> vector<8x10xf32>
    %cst_34 = arith.constant -1.000000e+09 : f32
    %82 = vector.broadcast %cst_34 : f32 to vector<8x10xf32>
    %83 = arith.select %10, %81, %82 : vector<8x10xi1>, vector<8x10xf32>
    %cst_35 = arith.constant dense<0xFF800000> : vector<8xf32>
    %84 = vector.multi_reduction <maximumf>, %83, %cst_35 [1] : vector<8x10xf32> to vector<8xf32>
    %85 = vector.shape_cast %84 : vector<8xf32> to vector<8x1xf32>
    %86 = vector.broadcast %85 : vector<8x1xf32> to vector<8x10xf32>
    %87 = arith.subf %83, %86 : vector<8x10xf32>
    %88 = math.exp %87 : vector<8x10xf32>
    %cst_36 = arith.constant dense<0.000000e+00> : vector<8xf32>
    %89 = vector.multi_reduction <add>, %88, %cst_36 [1] : vector<8x10xf32> to vector<8xf32>
    %90 = vector.shape_cast %89 : vector<8xf32> to vector<8x1xf32>
    %91 = tpu.reciprocal %90 {approx = true} : vector<8x1xf32> -> vector<8x1xf32>
    %92 = arith.mulf %90, %91 : vector<8x1xf32>
    %cst_37 = arith.constant 2.000000e+00 : f32
    %93 = vector.broadcast %cst_37 : f32 to vector<8x1xf32>
    %94 = arith.subf %93, %92 : vector<8x1xf32>
    %95 = arith.mulf %91, %94 : vector<8x1xf32>
    %96 = vector.broadcast %95 : vector<8x1xf32> to vector<8x10xf32>
    %97 = arith.mulf %88, %96 : vector<8x10xf32>
    %98 = arith.truncf %97 : vector<8x10xf32> to vector<8x10xbf16>
    %cst_38 = arith.constant dense<0.000000e+00> : vector<8x8xf32>
    %99 = tpu.matmul %98, %80, %cst_38 {dimension_numbers = #tpu.dot_dimension_numbers<[1], [0], [0], [1], [0, 0, 1, 1], [], []>} : vector<8x10xbf16>, vector<10x8xbf16>, vector<8x8xf32> -> vector<8x8xf32>
    %c0_39 = arith.constant 0 : index
    %c16 = arith.constant 16 : index
    %100 = vector.load %arg13[%c0_39, %c16] : memref<8x32xf32, #tpu.memory_space<vmem>>, vector<8x8xf32>
    tpu.vector_store %arg13[%c0_39, %c16], %99 {strides = array<i32>} : memref<8x32xf32, #tpu.memory_space<vmem>>, vector<8x8xf32>,
    %101 = vector.extract_strided_slice %15 {offsets = [0, 24], sizes = [8, 8], strides = [1, 1]} : vector<8x32xf32> to vector<8x8xf32>
    %102 = arith.truncf %101 : vector<8x8xf32> to vector<8x8xbf16>
    %103 = vector.extract_strided_slice %21 {offsets = [0, 24], sizes = [10, 8], strides = [1, 1]} : vector<10x32xf32> to vector<10x8xf32>
    %104 = arith.truncf %103 : vector<10x8xf32> to vector<10x8xbf16>
    %105 = vector.extract_strided_slice %22 {offsets = [0, 24], sizes = [10, 8], strides = [1, 1]} : vector<10x32xf32> to vector<10x8xf32>
    %106 = arith.truncf %105 : vector<10x8xf32> to vector<10x8xbf16>
    %cst_40 = arith.constant dense<0.000000e+00> : vector<8x10xf32>
    %107 = tpu.matmul %102, %104, %cst_40 {dimension_numbers = #tpu.dot_dimension_numbers<[1], [1], [0], [0], [0, 0, 1, 0], [], []>} : vector<8x8xbf16>, vector<10x8xbf16>, vector<8x10xf32> -> vector<8x10xf32>
    %cst_41 = arith.constant -1.000000e+09 : f32
    %108 = vector.broadcast %cst_41 : f32 to vector<8x10xf32>
    %109 = arith.select %10, %107, %108 : vector<8x10xi1>, vector<8x10xf32>
    %cst_42 = arith.constant dense<0xFF800000> : vector<8xf32>
    %110 = vector.multi_reduction <maximumf>, %109, %cst_42 [1] : vector<8x10xf32> to vector<8xf32>
    %111 = vector.shape_cast %110 : vector<8xf32> to vector<8x1xf32>
    %112 = vector.broadcast %111 : vector<8x1xf32> to vector<8x10xf32>
    %113 = arith.subf %109, %112 : vector<8x10xf32>
    %114 = math.exp %113 : vector<8x10xf32>
    %cst_43 = arith.constant dense<0.000000e+00> : vector<8xf32>
    %115 = vector.multi_reduction <add>, %114, %cst_43 [1] : vector<8x10xf32> to vector<8xf32>
    %116 = vector.shape_cast %115 : vector<8xf32> to vector<8x1xf32>
    %117 = tpu.reciprocal %116 {approx = true} : vector<8x1xf32> -> vector<8x1xf32>
    %118 = arith.mulf %116, %117 : vector<8x1xf32>
    %cst_44 = arith.constant 2.000000e+00 : f32
    %119 = vector.broadcast %cst_44 : f32 to vector<8x1xf32>
    %120 = arith.subf %119, %118 : vector<8x1xf32>
    %121 = arith.mulf %117, %120 : vector<8x1xf32>
    %122 = vector.broadcast %121 : vector<8x1xf32> to vector<8x10xf32>
    %123 = arith.mulf %114, %122 : vector<8x10xf32>
    %124 = arith.truncf %123 : vector<8x10xf32> to vector<8x10xbf16>
    %cst_45 = arith.constant dense<0.000000e+00> : vector<8x8xf32>
    %125 = tpu.matmul %124, %106, %cst_45 {dimension_numbers = #tpu.dot_dimension_numbers<[1], [0], [0], [1], [0, 0, 1, 1], [], []>} : vector<8x10xbf16>, vector<10x8xbf16>, vector<8x8xf32> -> vector<8x8xf32>
    %c0_46 = arith.constant 0 : index
    %c24 = arith.constant 24 : index
    %126 = vector.load %arg13[%c0_46, %c24] : memref<8x32xf32, #tpu.memory_space<vmem>>, vector<8x8xf32>
    tpu.vector_store %arg13[%c0_46, %c24], %125 {strides = array<i32>} : memref<8x32xf32, #tpu.memory_space<vmem>>, vector<8x8xf32>,
    %c0_47 = arith.constant 0 : index
    %c0_48 = arith.constant 0 : index
    %127 = vector.load %arg13[%c0_47, %c0_48] : memref<8x32xf32, #tpu.memory_space<vmem>>, vector<8x32xf32>
    %128 = arith.truncf %127 : vector<8x32xf32> to vector<8x32xbf16>
    %c0_49 = arith.constant 0 : index
    %c0_50 = arith.constant 0 : index
    %129 = vector.load %arg8[%c0_49, %c0_50] : memref<32x32xbf16, #tpu.memory_space<vmem>>, vector<32x32xbf16>
    %cst_51 = arith.constant dense<0.000000e+00> : vector<8x32xf32>
    %130 = tpu.matmul %128, %129, %cst_51 {dimension_numbers = #tpu.dot_dimension_numbers<[1], [0], [0], [1], [0, 0, 1, 1], [], []>} : vector<8x32xbf16>, vector<32x32xbf16>, vector<8x32xf32> -> vector<8x32xf32>
    %c0_52 = arith.constant 0 : index
    %c0_53 = arith.constant 0 : index
    %131 = vector.load %arg9[%c0_52, %c0_53] : memref<1x32xf32, #tpu.memory_space<vmem>>, vector<1x32xf32>
    %132 = vector.broadcast %131 : vector<1x32xf32> to vector<8x32xf32>
    %133 = arith.addf %130, %132 : vector<8x32xf32>
    %134 = arith.addf %133, %1 : vector<8x32xf32>
    %cst_54 = arith.constant dense<0.000000e+00> : vector<8xf32>
    %135 = vector.multi_reduction <add>, %134, %cst_54 [1] : vector<8x32xf32> to vector<8xf32>
    %136 = vector.shape_cast %135 : vector<8xf32> to vector<8x1xf32>
    %cst_55 = arith.constant 3.200000e+01 : f32
    %137 = vector.broadcast %cst_55 : f32 to vector<8x1xf32>
    %138 = arith.divf %136, %137 : vector<8x1xf32>
    %139 = vector.broadcast %138 : vector<8x1xf32> to vector<8x32xf32>
    %140 = arith.subf %134, %139 : vector<8x32xf32>
    %141 = arith.mulf %140, %140 : vector<8x32xf32>
    %cst_56 = arith.constant dense<0.000000e+00> : vector<8xf32>
    %142 = vector.multi_reduction <add>, %141, %cst_56 [1] : vector<8x32xf32> to vector<8xf32>
    %143 = vector.shape_cast %142 : vector<8xf32> to vector<8x1xf32>
    %cst_57 = arith.constant 3.200000e+01 : f32
    %144 = vector.broadcast %cst_57 : f32 to vector<8x1xf32>
    %145 = arith.divf %143, %144 : vector<8x1xf32>
    %146 = vector.broadcast %138 : vector<8x1xf32> to vector<8x32xf32>
    %147 = arith.subf %134, %146 : vector<8x32xf32>
    %cst_58 = arith.constant 9.99999997E-7 : f32
    %148 = vector.broadcast %cst_58 : f32 to vector<8x1xf32>
    %149 = arith.addf %145, %148 : vector<8x1xf32>
    %150 = math.rsqrt %149 : vector<8x1xf32>
    %151 = vector.broadcast %150 : vector<8x1xf32> to vector<8x32xf32>
    %152 = arith.mulf %147, %151 : vector<8x32xf32>
    %c0_59 = arith.constant 0 : index
    %c0_60 = arith.constant 0 : index
    %153 = vector.load %arg10[%c0_59, %c0_60] : memref<1x32xf32, #tpu.memory_space<vmem>>, vector<1x32xf32>
    %154 = vector.broadcast %153 : vector<1x32xf32> to vector<8x32xf32>
    %155 = arith.mulf %152, %154 : vector<8x32xf32>
    %c0_61 = arith.constant 0 : index
    %c0_62 = arith.constant 0 : index
    %156 = vector.load %arg11[%c0_61, %c0_62] : memref<1x32xf32, #tpu.memory_space<vmem>>, vector<1x32xf32>
    %157 = vector.broadcast %156 : vector<1x32xf32> to vector<8x32xf32>
    %158 = arith.addf %155, %157 : vector<8x32xf32>
    %c0_63 = arith.constant 0 : index
    %c0_64 = arith.constant 0 : index
    %c0_65 = arith.constant 0 : index
    %159 = vector.load %arg12[%c0_63, %c0_64, %c0_65] : memref<1x8x32xf32, #tpu.memory_space<vmem>>, vector<1x8x32xf32>
    %160 = vector.shape_cast %159 : vector<1x8x32xf32> to vector<8x32xf32>
    %161 = vector.shape_cast %158 : vector<8x32xf32> to vector<1x8x32xf32>
    tpu.vector_store %arg12[%c0_63, %c0_64, %c0_65], %161 {strides = array<i32>} : memref<1x8x32xf32, #tpu.memory_space<vmem>>, vector<1x8x32xf32>,
    return
  }
  func.func @transform_0(%arg0: i32) -> (i32, i32, i32) {
    %c0_i32 = arith.constant 0 : i32
    %c0_i32_0 = arith.constant 0 : i32
    %c0_i32_1 = arith.constant 0 : i32
    return %arg0, %c0_i32, %c0_i32_0 : i32, i32, i32
  }
  func.func @transform_1(%arg0: i32) -> (i32, i32, i32) {
    %c0_i32 = arith.constant 0 : i32
    %c0_i32_0 = arith.constant 0 : i32
    %c0_i32_1 = arith.constant 0 : i32
    return %arg0, %c0_i32, %c0_i32_0 : i32, i32, i32
  }
  func.func @transform_2(%arg0: i32) -> (i32, i32, i32) {
    %c0_i32 = arith.constant 0 : i32
    %c0_i32_0 = arith.constant 0 : i32
    %c0_i32_1 = arith.constant 0 : i32
    return %arg0, %c0_i32, %c0_i32_0 : i32, i32, i32
  }
  func.func @transform_3(%arg0: i32) -> (i32, i32) {
    %c0_i32 = arith.constant 0 : i32
    %c0_i32_0 = arith.constant 0 : i32
    %c0_i32_1 = arith.constant 0 : i32
    return %c0_i32, %c0_i32_0 : i32, i32
  }
  func.func @transform_4(%arg0: i32) -> (i32, i32) {
    %c0_i32 = arith.constant 0 : i32
    %c0_i32_0 = arith.constant 0 : i32
    %c0_i32_1 = arith.constant 0 : i32
    return %c0_i32, %c0_i32_0 : i32, i32
  }
  func.func @transform_5(%arg0: i32) -> (i32, i32) {
    %c0_i32 = arith.constant 0 : i32
    %c0_i32_0 = arith.constant 0 : i32
    %c0_i32_1 = arith.constant 0 : i32
    return %c0_i32, %c0_i32_0 : i32, i32
  }
  func.func @transform_6(%arg0: i32) -> (i32, i32) {
    %c0_i32 = arith.constant 0 : i32
    %c0_i32_0 = arith.constant 0 : i32
    %c0_i32_1 = arith.constant 0 : i32
    return %c0_i32, %c0_i32_0 : i32, i32
  }
  func.func @transform_7(%arg0: i32) -> (i32, i32) {
    %c0_i32 = arith.constant 0 : i32
    %c0_i32_0 = arith.constant 0 : i32
    %c0_i32_1 = arith.constant 0 : i32
    return %c0_i32, %c0_i32_0 : i32, i32
  }
  func.func @transform_8(%arg0: i32) -> (i32, i32) {
    %c0_i32 = arith.constant 0 : i32
    %c0_i32_0 = arith.constant 0 : i32
    %c0_i32_1 = arith.constant 0 : i32
    return %c0_i32, %c0_i32_0 : i32, i32
  }
  func.func @transform_9(%arg0: i32) -> (i32, i32) {
    %c0_i32 = arith.constant 0 : i32
    %c0_i32_0 = arith.constant 0 : i32
    %c0_i32_1 = arith.constant 0 : i32
    return %c0_i32, %c0_i32_0 : i32, i32
  }
  func.func @transform_10(%arg0: i32) -> (i32, i32) {
    %c0_i32 = arith.constant 0 : i32
    %c0_i32_0 = arith.constant 0 : i32
    %c0_i32_1 = arith.constant 0 : i32
    return %c0_i32, %c0_i32_0 : i32, i32
  }
  func.func @transform_11(%arg0: i32) -> (i32, i32, i32) {
    %c0_i32 = arith.constant 0 : i32
    %c0_i32_0 = arith.constant 0 : i32
    %c0_i32_1 = arith.constant 0 : i32
    return %arg0, %c0_i32, %c0_i32_0 : i32, i32, i32
  }
}

module attributes {stable_mosaic.version = 11 : i64} {
  func.func @_ffn_addln_kernel(%arg0: i32, %arg1: memref<16x32xf32, #tpu.memory_space<vmem>>, %arg2: memref<32x128xbf16, #tpu.memory_space<vmem>>, %arg3: memref<1x128xf32, #tpu.memory_space<vmem>>, %arg4: memref<128x32xbf16, #tpu.memory_space<vmem>>, %arg5: memref<1x32xf32, #tpu.memory_space<vmem>>, %arg6: memref<1x32xf32, #tpu.memory_space<vmem>>, %arg7: memref<1x32xf32, #tpu.memory_space<vmem>>, %arg8: memref<16x32xf32, #tpu.memory_space<vmem>>) attributes {dimension_semantics = [#tpu.dimension_semantics<parallel>], iteration_bounds = array<i64: 1>, scalar_prefetch = 0 : i64, scratch_operands = 0 : i64, tpu.core_type = #tpu.core_type<tc>, window_params = [{transform_indices = @transform_0, window_bounds = array<i64: 16, 32>}, {pipeline_mode = #tpu.pipeline_mode<synchronous>, transform_indices = @transform_1, window_bounds = array<i64: 32, 128>}, {pipeline_mode = #tpu.pipeline_mode<synchronous>, transform_indices = @transform_2, window_bounds = array<i64: 1, 128>}, {pipeline_mode = #tpu.pipeline_mode<synchronous>, transform_indices = @transform_3, window_bounds = array<i64: 128, 32>}, {pipeline_mode = #tpu.pipeline_mode<synchronous>, transform_indices = @transform_4, window_bounds = array<i64: 1, 32>}, {pipeline_mode = #tpu.pipeline_mode<synchronous>, transform_indices = @transform_5, window_bounds = array<i64: 1, 32>}, {pipeline_mode = #tpu.pipeline_mode<synchronous>, transform_indices = @transform_6, window_bounds = array<i64: 1, 32>}, {transform_indices = @transform_7, window_bounds = array<i64: 16, 32>}]} {
    %c0 = arith.constant 0 : index
    %c0_0 = arith.constant 0 : index
    %0 = vector.load %arg1[%c0, %c0_0] : memref<16x32xf32, #tpu.memory_space<vmem>>, vector<16x32xf32>
    %1 = arith.truncf %0 : vector<16x32xf32> to vector<16x32xbf16>
    %c0_1 = arith.constant 0 : index
    %c0_2 = arith.constant 0 : index
    %2 = vector.load %arg2[%c0_1, %c0_2] : memref<32x128xbf16, #tpu.memory_space<vmem>>, vector<32x128xbf16>
    %cst = arith.constant dense<0.000000e+00> : vector<16x128xf32>
    %3 = tpu.matmul %1, %2, %cst {dimension_numbers = #tpu.dot_dimension_numbers<[1], [0], [0], [1], [0, 0, 1, 1], [], []>} : vector<16x32xbf16>, vector<32x128xbf16>, vector<16x128xf32> -> vector<16x128xf32>
    %c0_3 = arith.constant 0 : index
    %c0_4 = arith.constant 0 : index
    %4 = vector.load %arg3[%c0_3, %c0_4] : memref<1x128xf32, #tpu.memory_space<vmem>>, vector<1x128xf32>
    %5 = vector.broadcast %4 : vector<1x128xf32> to vector<16x128xf32>
    %6 = arith.addf %3, %5 : vector<16x128xf32>
    %cst_5 = arith.constant 0.000000e+00 : f32
    %7 = vector.broadcast %cst_5 : f32 to vector<16x128xf32>
    %8 = arith.maximumf %6, %7 : vector<16x128xf32>
    %9 = arith.truncf %8 : vector<16x128xf32> to vector<16x128xbf16>
    %c0_6 = arith.constant 0 : index
    %c0_7 = arith.constant 0 : index
    %10 = vector.load %arg4[%c0_6, %c0_7] : memref<128x32xbf16, #tpu.memory_space<vmem>>, vector<128x32xbf16>
    %cst_8 = arith.constant dense<0.000000e+00> : vector<16x32xf32>
    %11 = tpu.matmul %9, %10, %cst_8 {dimension_numbers = #tpu.dot_dimension_numbers<[1], [0], [0], [1], [0, 0, 1, 1], [], []>} : vector<16x128xbf16>, vector<128x32xbf16>, vector<16x32xf32> -> vector<16x32xf32>
    %c0_9 = arith.constant 0 : index
    %c0_10 = arith.constant 0 : index
    %12 = vector.load %arg5[%c0_9, %c0_10] : memref<1x32xf32, #tpu.memory_space<vmem>>, vector<1x32xf32>
    %13 = vector.broadcast %12 : vector<1x32xf32> to vector<16x32xf32>
    %14 = arith.addf %11, %13 : vector<16x32xf32>
    %15 = arith.addf %14, %0 : vector<16x32xf32>
    %cst_11 = arith.constant dense<0.000000e+00> : vector<16xf32>
    %16 = vector.multi_reduction <add>, %15, %cst_11 [1] : vector<16x32xf32> to vector<16xf32>
    %17 = vector.shape_cast %16 : vector<16xf32> to vector<16x1xf32>
    %cst_12 = arith.constant 3.200000e+01 : f32
    %18 = vector.broadcast %cst_12 : f32 to vector<16x1xf32>
    %19 = arith.divf %17, %18 : vector<16x1xf32>
    %20 = vector.broadcast %19 : vector<16x1xf32> to vector<16x32xf32>
    %21 = arith.subf %15, %20 : vector<16x32xf32>
    %22 = arith.mulf %21, %21 : vector<16x32xf32>
    %cst_13 = arith.constant dense<0.000000e+00> : vector<16xf32>
    %23 = vector.multi_reduction <add>, %22, %cst_13 [1] : vector<16x32xf32> to vector<16xf32>
    %24 = vector.shape_cast %23 : vector<16xf32> to vector<16x1xf32>
    %cst_14 = arith.constant 3.200000e+01 : f32
    %25 = vector.broadcast %cst_14 : f32 to vector<16x1xf32>
    %26 = arith.divf %24, %25 : vector<16x1xf32>
    %27 = vector.broadcast %19 : vector<16x1xf32> to vector<16x32xf32>
    %28 = arith.subf %15, %27 : vector<16x32xf32>
    %cst_15 = arith.constant 9.99999997E-7 : f32
    %29 = vector.broadcast %cst_15 : f32 to vector<16x1xf32>
    %30 = arith.addf %26, %29 : vector<16x1xf32>
    %31 = math.rsqrt %30 : vector<16x1xf32>
    %32 = vector.broadcast %31 : vector<16x1xf32> to vector<16x32xf32>
    %33 = arith.mulf %28, %32 : vector<16x32xf32>
    %c0_16 = arith.constant 0 : index
    %c0_17 = arith.constant 0 : index
    %34 = vector.load %arg6[%c0_16, %c0_17] : memref<1x32xf32, #tpu.memory_space<vmem>>, vector<1x32xf32>
    %35 = vector.broadcast %34 : vector<1x32xf32> to vector<16x32xf32>
    %36 = arith.mulf %33, %35 : vector<16x32xf32>
    %c0_18 = arith.constant 0 : index
    %c0_19 = arith.constant 0 : index
    %37 = vector.load %arg7[%c0_18, %c0_19] : memref<1x32xf32, #tpu.memory_space<vmem>>, vector<1x32xf32>
    %38 = vector.broadcast %37 : vector<1x32xf32> to vector<16x32xf32>
    %39 = arith.addf %36, %38 : vector<16x32xf32>
    %c0_20 = arith.constant 0 : index
    %c0_21 = arith.constant 0 : index
    %40 = vector.load %arg8[%c0_20, %c0_21] : memref<16x32xf32, #tpu.memory_space<vmem>>, vector<16x32xf32>
    tpu.vector_store %arg8[%c0_20, %c0_21], %39 {strides = array<i32>} : memref<16x32xf32, #tpu.memory_space<vmem>>, vector<16x32xf32>,
    return
  }
  func.func @transform_0(%arg0: i32) -> (i32, i32) {
    %c0_i32 = arith.constant 0 : i32
    %c0_i32_0 = arith.constant 0 : i32
    return %arg0, %c0_i32 : i32, i32
  }
  func.func @transform_1(%arg0: i32) -> (i32, i32) {
    %c0_i32 = arith.constant 0 : i32
    %c0_i32_0 = arith.constant 0 : i32
    %c0_i32_1 = arith.constant 0 : i32
    return %c0_i32, %c0_i32_0 : i32, i32
  }
  func.func @transform_2(%arg0: i32) -> (i32, i32) {
    %c0_i32 = arith.constant 0 : i32
    %c0_i32_0 = arith.constant 0 : i32
    %c0_i32_1 = arith.constant 0 : i32
    return %c0_i32, %c0_i32_0 : i32, i32
  }
  func.func @transform_3(%arg0: i32) -> (i32, i32) {
    %c0_i32 = arith.constant 0 : i32
    %c0_i32_0 = arith.constant 0 : i32
    %c0_i32_1 = arith.constant 0 : i32
    return %c0_i32, %c0_i32_0 : i32, i32
  }
  func.func @transform_4(%arg0: i32) -> (i32, i32) {
    %c0_i32 = arith.constant 0 : i32
    %c0_i32_0 = arith.constant 0 : i32
    %c0_i32_1 = arith.constant 0 : i32
    return %c0_i32, %c0_i32_0 : i32, i32
  }
  func.func @transform_5(%arg0: i32) -> (i32, i32) {
    %c0_i32 = arith.constant 0 : i32
    %c0_i32_0 = arith.constant 0 : i32
    %c0_i32_1 = arith.constant 0 : i32
    return %c0_i32, %c0_i32_0 : i32, i32
  }
  func.func @transform_6(%arg0: i32) -> (i32, i32) {
    %c0_i32 = arith.constant 0 : i32
    %c0_i32_0 = arith.constant 0 : i32
    %c0_i32_1 = arith.constant 0 : i32
    return %c0_i32, %c0_i32_0 : i32, i32
  }
  func.func @transform_7(%arg0: i32) -> (i32, i32) {
    %c0_i32 = arith.constant 0 : i32
    %c0_i32_0 = arith.constant 0 : i32
    return %arg0, %c0_i32 : i32, i32
  }
}

</mosaic_0001>

<bundles_post_ra>
// kernel: decoder_layer_forward.5
= control target key start
LH: loop header
LB: loop body
LE: loop exit
PB: predicated region body
PF: predicated region fallthrough
CT: control target
= control target key end

     0   :  { %v377_v1 = vmov 0.0   ;;  %vm378_vm0 = vmmov 0   ;;  %vm54_vm1 = vcmask 261120   ;;  %s489_s0 = inlined_call_operand.vmem [shape: f32[16,32], index: 0, kind: input, shape index: {}]   ;;  %s490_s1 = inlined_call_operand.vmem [shape: bf16[32,128], index: 1, kind: input, shape index: {}]   ;;  %s491_s2 = inlined_call_operand.vmem [shape: f32[1,128], index: 2, kind: input, shape index: {}]   ;;  %s492_s3 = inlined_call_operand.vmem [shape: bf16[128,32], index: 3, kind: input, shape index: {}]   ;;  %s493_s4 = inlined_call_operand.vmem [shape: f32[1,32], index: 4, kind: input, shape index: {}]   ;;  %s494_s5 = inlined_call_operand.vmem [shape: f32[1,32], index: 5, kind: input, shape index: {}]   ;;  %s495_s6 = inlined_call_operand.vmem [shape: f32[1,32], index: 6, kind: input, shape index: {}]   ;;  %s496_s7 = inlined_call_operand.hbm [shape: f32[16,32], index: 7, kind: output, shape index: {}]  }
   0x1   :  { %v339_v0 = vld [vmem:[%s490_s1] sm:$0xff]   ;;  %306 = vmatprep.subr.bf16.mxu0 %v377_v1  ;;  %v340_v2 = vld [vmem:[%s490_s1 + $0x8] sm:$0xff]   ;;  %314 = vmatprep.subr.bf16.mxu1 %v377_v1  ;;  %v343_v8 = vld [vmem:[%s492_s3 + $0x10] sm:$0xff]  }
   0x2   :  { %307 = vmatpush3.bf16.msra.mxu0 %v339_v0  ;;  %310 = vmatprep.mubr.msk.bf16.mxu0 %vm378_vm0, %v377_v1  ;;  %v28_v3 = vld [vmem:[%s489_s0] sm:$0xff]  ;;  %v29_v4 = vld [vmem:[%s489_s0 + $0x8] sm:$0xff] }
   0x3   :  { %308 = vmatprep.subr.bf16.mxu0 %v377_v1  ;;  %v341_v5 = vld [vmem:[%s492_s3] sm:$0xff]   ;;  %330 = vmatprep.mubr.msk.bf16.mxu1 %vm378_vm0, %v377_v1  ;;  %v30_v6 = vpack.c.bf16 %v29_v4, %v28_v3  ;;  %v342_v7 = vld [vmem:[%s492_s3 + $0x8] sm:$0xff]  }
   0x4   :  { %315 = vmatpush3.bf16.msra.mxu1 %v341_v5 }
   0x5   :  { %316 = vmatprep.subr.bf16.mxu1 %v377_v1 }
   0x6   :  { %309 = vmatpush3.bf16.msra.mxu0 %v340_v2 }
   0x8   :  { %317 = vmatpush3.bf16.msra.mxu1 %v342_v7 }
   0x9   :  { %311 = vmatmul.mubr.msk.bf16.vlgmr.msra.gmra.mrb[0].mxu0 %vm54_vm1, %v30_v6  ;;  %318 = vmatprep.subr.bf16.mxu1 %v377_v1 }
   0xa   :  { %12 = vsyncpa [#allocation3], 0  ;;  %v344_v9 = vld [vmem:[%s492_s3 + $0x18] sm:$0xff]   ;;  %v345_v10 = vld [vmem:[%s492_s3 + $0x20] sm:$0xff]   ;;  %s379_s28 = smov [#allocation2]  }
   0xb   :  { %v346_v11 = vld [vmem:[%s492_s3 + $0x28] sm:$0xff]   ;;  %v347_v12 = vld [vmem:[%s492_s3 + $0x30] sm:$0xff]   ;;  %v348_v13 = vld [vmem:[%s492_s3 + $0x38] sm:$0xff]   ;;  %s268_s29 = sshll.u32 %s379_s28, 4  ;;  %s269_s29 = int_to_ptr.vmem [resolvable:$true] %s268_s29 }
   0xc   :  { %319 = vmatpush3.bf16.msra.mxu1 %v343_v8  ;;  %v279_v14 = vld [vmem:[%s491_s2] ss:$0 sm:$0xff]  ;;  %s353_s30 = scalar_lea.vmem %s269_s29, 256  ;;  %p358_p1 = scmp.lt.s32.totalorder %s269_s29, %s269_s29 }
   0xd   :  { %320 = vmatprep.subr.bf16.mxu1 %v377_v1  ;;  %v283_v24 = vld [vmem:[%s493_s4] ss:$0 sm:$0xff]  ;;  %p354_p0 = scmp.ne.s32.totalorder %s269_s29, %s353_s30  ;;  %p359_p2 = scmp.lt.s32.totalorder %s353_s30, %s353_s30 }
   0xe   :  { %v292_v52 = vld [vmem:[%s494_s5] ss:$0 sm:$0xff] }
   0xf   :  { %v293_v54 = vld [vmem:[%s495_s6] ss:$0 sm:$0xff]  ;;  %p360_p3 = por %p359_p2, %p358_p1 }
  0x10   :  { %321 = vmatpush3.bf16.msra.mxu1 %v344_v9 }
  0x11   :  { %322 = vmatprep.subr.bf16.mxu1 %v377_v1  ;;  %p361_p4 = pnand %p360_p3, %p354_p0 }
  0x14   :  { %323 = vmatpush3.bf16.msra.mxu1 %v345_v10 }
  0x15   :  { %324 = vmatprep.subr.bf16.mxu1 %v377_v1 }
  0x18   :  { %325 = vmatpush3.bf16.msra.mxu1 %v346_v11 }
  0x19   :  { %326 = vmatprep.subr.bf16.mxu1 %v377_v1 }
  0x1c   :  { %327 = vmatpush3.bf16.msra.mxu1 %v347_v12 }
  0x1d   :  { %328 = vmatprep.subr.bf16.mxu1 %v377_v1 }
  0x20   :  { %329 = vmatpush3.bf16.msra.mxu1 %v348_v13 }
  0xdc   :  { %v92_v15 = vpop.f32.mrb[0].mxu0 }
  0xdd   :  { %v93_v16 = vadd.f32 %v279_v14, %v92_v15  ;;  %v312_v17 = vpop.f32.mrb[1].mxu0 }
  0xde   :  { %v95_v18 = vpop.f32.mrb[2].mxu0 }
  0xdf   :  { %v96_v19 = vadd.f32 %v279_v14, %v95_v18  ;;  %v313_v20 = vpop.f32.mrb[3].mxu0  ;;  %v99_v21 = vmax.f32 %v93_v16, 0.0 }
  0xe1   :  { %v100_v22 = vmax.f32 %v96_v19, 0.0 }
  0xe3   :  { %v101_v23 = vpack.c.bf16 %v100_v22, %v99_v21 }
  0xe5   :  { %331 = vmatmul.mubr.bf16.vlgmr.msra.gmra.mrb[0].mxu1 %v101_v23 }
 0x1b8   :  { %v207_v25 = vpop.f32.mrb[0].mxu1 }
 0x1b9   :  { %v208_v26 = vadd.f32 %v283_v24, %v207_v25  ;;  %v332_v27 = vpop.f32.mrb[1].mxu1 }
 0x1ba   :  { %v210_v28 = vpop.f32.mrb[2].mxu1 }
 0x1bb   :  { %v211_v29 = vadd.f32 %v283_v24, %v210_v28  ;;  %v333_v30 = vpop.f32.mrb[3].mxu1  ;;  %v214_v31 = vadd.f32 %v208_v26, %v28_v3 }
 0x1bd   :  { %v216_v32 = vsel %vm54_vm1, %v214_v31, 0.0  ;;  %v215_v33 = vadd.f32 %v211_v29, %v29_v4 }
 0x1be   :  { %217 = vadd.xlane.f32.xlu0 %v216_v32 }
 0x1bf   :  { %v219_v34 = vsel %vm54_vm1, %v215_v33, 0.0 }
 0x1c2   :  { %220 = vadd.xlane.f32.xlu0 %v219_v34 }
 0x24b   :  { %v218_v35 = vpop.xlane.xlu0 %217 }
 0x24c   :  { %v223_v36 = vmul.f32 0.03125, %v218_v35 }
 0x24e   :  { %v225_v37 = vsub.f32 %v214_v31, %v223_v36 }
 0x24f   :  { %v221_v38 = vpop.xlane.xlu0 %220 }
 0x250   :  { %v224_v39 = vmul.f32 0.03125, %v221_v38  ;;  %v227_v40 = vmul.f32 %v225_v37, %v225_v37 }
 0x252   :  { %v226_v41 = vsub.f32 %v215_v33, %v224_v39  ;;  %v229_v42 = vsel %vm54_vm1, %v227_v40, 0.0 }
 0x253   :  { %230 = vadd.xlane.f32.xlu1 %v229_v42 }
 0x254   :  { %v228_v43 = vmul.f32 %v226_v41, %v226_v41 }
 0x256   :  { %v232_v44 = vsel %vm54_vm1, %v228_v43, 0.0 }
 0x257   :  { %233 = vadd.xlane.f32.xlu1 %v232_v44 }
 0x2e0   :  { %v231_v45 = vpop.xlane.xlu1 %230 }
 0x2e1   :  { %v235_v46 = vmul.f32 0.03125, %v231_v45 }
 0x2e3   :  { %v237_v47 = vadd.f32 1e-06, %v235_v46 }
 0x2e4   :  { %v234_v48 = vpop.xlane.xlu1 %233 }
 0x2e5   :  { %349 = vrsqrt.f32 %v237_v47  ;;  %v236_v49 = vmul.f32 0.03125, %v234_v48 }
 0x2e7   :  { %v238_v50 = vadd.f32 1e-06, %v236_v49 }
 0x2e9   :  { %351 = vrsqrt.f32 %v238_v50 }
 0x2ef   :  { %v350_v51 = vpop.eup %349 }
 0x2f0   :  { %v241_v53 = vmul.f32 %v350_v51, %v225_v37 }
 0x2f2   :  { %v250_v55 = vmul.f32 %v292_v52, %v241_v53 }
 0x2f3   :  { %v352_v56 = vpop.eup %351 }
 0x2f4   :  { %v242_v57 = vmul.f32 %v352_v56, %v226_v41  ;;  %v259_v58 = vadd.f32 %v293_v54, %v250_v55 }
 0x2f6   :  { %v251_v59 = vmul.f32 %v292_v52, %v242_v57  ;;  %261 = vst.msk [vmem:[#allocation2] sm:$0xff] %vm54_vm1, %v259_v58 }
 0x2f8   :  { %v260_v60 = vadd.f32 %v293_v54, %v251_v59 }
 0x2fa   :  { %262 = vst.msk [vmem:[#allocation2 + $0x8] sm:$0xff] %vm54_vm1, %v260_v60 }
 0x2fb   :  { %364 = shalt.err (!%p361_p4)
}
 0x2fc   :  { %s365_s8 = scalar_lea.hbm %s496_s7, 256 }
 0x2fd   :  { %p366_p5 = scmp.ne.s32.totalorder %s496_s7, %s365_s8  ;;  %p369_p6 = scmp.lt.u32.totalorder %s365_s8, %s496_s7 }
 0x2ff   :  { %p371_p7 = pnand %p369_p6, %p366_p5 }
 0x301   :  { %374 = shalt.err (!%p371_p7)
}
 0x302   :  { %s380_s12 = smov 128   ;;  %s381_s13 = smov 8  }
 0x303   :  { %274 = dma.vmem_to_hbm [thread:$0]  %s269_s29, 256, %s496_s7, [#allocation3], %s380_s12, %s380_s12, %s381_s13  }
 0x304   :  { %375 = dma.done.wait [#allocation3], 256  }
 0x305   :  { %376 = vsyncadd [#allocation3], 4294967040 }
 0x306   :  { %278 = vsyncpa [#allocation3], 1 }

// kernel: decoder_layer_forward.4
= control target key start
LH: loop header
LB: loop body
LE: loop exit
PB: predicated region body
PF: predicated region fallthrough
CT: control target
= control target key end

     0   :  { %s1474_s17 = smov 0   ;;  %s1625_s0 = inlined_call_operand.vmem [shape: f32[2,8,32], index: 0, kind: input, shape index: {}]   ;;  %s1626_s1 = inlined_call_operand.vmem [shape: f32[2,10,32], index: 1, kind: input, shape index: {}]   ;;  %s1627_s2 = inlined_call_operand.vmem [shape: s8[2,8,10], index: 2, kind: input, shape index: {}]   ;;  %s1628_s3 = inlined_call_operand.vmem [shape: bf16[32,32], index: 3, kind: input, shape index: {}]   ;;  %s1629_s4 = inlined_call_operand.vmem [shape: f32[1,32], index: 4, kind: input, shape index: {}]   ;;  %s1630_s5 = inlined_call_operand.vmem [shape: bf16[32,64], index: 5, kind: input, shape index: {}]   ;;  %s1631_s6 = inlined_call_operand.vmem [shape: f32[1,64], index: 6, kind: input, shape index: {}]   ;;  %s1632_s7 = inlined_call_operand.vmem [shape: bf16[32,32], index: 7, kind: input, shape index: {}]   ;;  %s1633_s8 = inlined_call_operand.vmem [shape: f32[1,32], index: 8, kind: input, shape index: {}]   ;;  %s1634_s9 = inlined_call_operand.vmem [shape: f32[1,32], index: 9, kind: input, shape index: {}]   ;;  %s1635_s10 = inlined_call_operand.vmem [shape: f32[1,32], index: 10, kind: input, shape index: {}]   ;;  %s1636_s11 = inlined_call_operand.vmem [shape: f32[2,8,32], index: 11, kind: output, shape index: {}]  }
   0x1 LB: > { %s1218_s18 = sadd.s32 4294967295, %s1400_s17   ;;  %p1222_p0 = scmp.ge.s32.totalorder %s1400_s17, 1  ;;  %s1400_s17 = sphi %s1474_s17, %s21_s17  }
   0x2   : > { %p355_p1 = scmp.lt.s32.totalorder %s1400_s17, 3 }
   0x4   : > { %p356_p2 = pnand %p1222_p0, %p355_p1 }
   0x5   : > { %v1370_v0 = vld [vmem:[%s1630_s5] sm:$0xff] (!%p356_p2)   ;;  %v1402_v1 = vmov (!%p356_p2), 0.0   ;;  %v1371_v2 = vld [vmem:[%s1630_s5 + $0x8] sm:$0xff] (!%p356_p2)   ;;  %vm1403_vm0 = vmmov (!%p356_p2), 0   ;;  %p402_p3 = scmp.lt.s32.totalorder (!%p356_p2), %s1218_s18, 1  ;;  %vm452_vm1 = vcmask (!%p356_p2), 261120  }
   0x6   : > { %359 = sbr.rel (%p356_p2) target bundleno = 1781 (0x6f5), region = 64  ;;  %1286 = vmatprep.subr.bf16.mxu1 (!%p356_p2), %v1402_v1  ;;  %1278 = vmatprep.subr.bf16.mxu0 (!%p356_p2), %v1402_v1  ;;  %v1372_v3 = vld [vmem:[%s1628_s3] sm:$0xff] (!%p356_p2)   ;;  %v1373_v4 = vld [vmem:[%s1628_s3 + $0x8] sm:$0xff] (!%p356_p2)   ;;  %vm565_vm2 = vcmask (!%p356_p2), 64512   ;;  %s1404_s22 = smov (!%p356_p2), 112   ;;  %vm613_vm4 = vcmask (!%p356_p2), 80896  }
   0x7   : > { %1287 = vmatpush3.bf16.msra.mxu1 (!%p356_p2), %v1370_v0  ;;  %1290 = vmatprep.mubr.msk.bf16.mxu1 (!%p356_p2), %vm1403_vm0, %v1402_v1  ;;  %v1232_v10 = vld [vmem:[%s1631_s6] ss:$0 sm:$0xff] (!%p356_p2)  ;;  %s1405_s23 = smov (!%p356_p2), 120   ;;  %s1406_s24 = smov (!%p356_p2), 104   ;;  %vm635_vm5 = vcmask (!%p356_p2), 1044480   ;;  %vm799_vm6 = vcmask (!%p356_p2), 130112  }
   0x8   : > { %1288 = vmatprep.subr.bf16.mxu1 (!%p356_p2), %v1402_v1  ;;  %1282 = vmatprep.mubr.msk.bf16.mxu0 (!%p356_p2), %vm1403_vm0, %v1402_v1  ;;  %v1228_v12 = vld [vmem:[%s1629_s4] ss:$0 sm:$0xff] (!%p356_p2)  ;;  %s1407_s30 = smov (!%p356_p2), 96   ;;  %s1409_s13 = smov (!%p356_p2), 72   ;;  %vm919_vm7 = vcmask (!%p356_p2), 195712   ;;  %vm1039_vm8 = vcmask (!%p356_p2), 261312  }
   0x9   : > { %1279 = vmatpush3.bf16.msra.mxu0 (!%p356_p2), %v1372_v3  ;;  %s1410_s14 = smov (!%p356_p2), 88  }
   0xa   : > { %1280 = vmatprep.subr.bf16.mxu0 (!%p356_p2), %v1402_v1 }
   0xb   : > { %1289 = vmatpush3.bf16.msra.mxu1 (!%p356_p2), %v1371_v2 }
   0xc   : > { %1300 = vmatprep.subr.bf16.mxu1 (!%p356_p2), %v1402_v1 }
   0xd   : > { %s1638_s18 = smov (!%p402_p3, %s1218_s18), 1  ;;  %1281 = vmatpush3.bf16.msra.mxu0 %v1373_v4 }
   0xe   : > { %s1252_s27 = sshll.u32 %s1638_s18, 4  ;;  %s1223_s28 = sshll.u32 %s1638_s18, 3  ;;  %1294 = vmatprep.subr.bf16.mxu0 %v1402_v1 }
   0xf   : > { %s410_s12 = scalar_lea.vmem %s1626_s1, %s1252_s27  ;;  %s405_s15 = scalar_lea.vmem %s1625_s0, %s1223_s28 }
  0x10   : > { %v422_v5 = vld [vmem:[%s410_s12] sm:$0xff]  ;;  %v423_v6 = vld [vmem:[%s410_s12 + $0x8] sm:$0x3]  ;;  %s1226_s25 = sshll.u32 %s1638_s18, 1  ;;  %s1408_s12 = smov 80  }
  0x11   : > { %v1515_v7 = vld [vmem:[%s405_s15] sm:$0xff]  ;;  %v424_v8 = vpack.c.bf16 %v423_v6, %v422_v5  ;;  %s414_s29 = scalar_lea.vmem %s1627_s2, %s1226_s25  ;;  %s1411_s15 = smov 8  }
  0x12   : > { %v421_v9 = vpack.c.bf16 %v1515_v7, %v1515_v7  ;;  %v425_v35 = vld [vmem:[%s414_s29] sm:$0x3] }
  0x13   : > { %1291 = vmatmul.mubr.msk.bf16.vlgmr.msra.gmra.mrb[0].mxu1 %vm452_vm1, %v424_v8  ;;  %v426_v36 = vunpack.c.0.s8 %v425_v35 }
  0x14   : > { %1283 = vmatmul.mubr.msk.bf16.vlgmr.msra.gmra.mrb[0].mxu0 %vm452_vm1, %v421_v9  ;;  %1302 = vmatprep.mubr.msk.bf16.mxu1 %vm1403_vm0, %v1402_v1 }
  0x15   : > { %1296 = vmatprep.mubr.msk.bf16.mxu0 %vm1403_vm0, %v1402_v1  ;;  %v427_v37 = vcvt.s32.f32 %v426_v36 }
  0x17   : > { %vm428_vm3 = vcmp.gt.f32.partialorder %v427_v37, 0.0 }
  0xe6   : > { %v556_v11 = vpop.f32.mrb[0].mxu1 }
  0xe7   : > { %v490_v13 = vpop.f32.mrb[0].mxu0  ;;  %v1292_v14 = vpop.f32.mrb[1].mxu1  ;;  %v557_v18 = vadd.f32 %v1232_v10, %v556_v11 }
  0xe8   : > { %v1284_v15 = vpop.f32.mrb[1].mxu0  ;;  %v559_v16 = vpop.f32.mrb[2].mxu1  ;;  %v491_v21 = vadd.f32 %v1228_v12, %v490_v13 }
  0xe9   : > { %v493_v17 = vpop.f32.mrb[2].mxu0  ;;  %v560_v19 = vadd.f32 %v1232_v10, %v559_v16  ;;  %v1293_v20 = vpop.f32.mrb[3].mxu1 }
  0xea   : > { %v1285_v22 = vpop.f32.mrb[3].mxu0  ;;  %v563_v24 = vpack.c.bf16 %v491_v21, %v491_v21 }
  0xeb   : > { %v1532_v23 = vpack.c.bf16 %v560_v19, %v557_v18 }
  0xed   : > { %803 = vrot.lane.b32.xlu1 %v1532_v23, %s1404_s22  ;;  %683 = vrot.lane.b32.xlu0 %v1532_v23, %s1405_s23  ;;  %v570_v25 = vsel %vm565_vm2, %v1532_v23, 0 }
  0xee   : > { %1295 = vmatpush3.bf16.xpose.msra.mxu0 %v570_v25 }
  0xef   : > { %1306 = vmatprep.subr.bf16.mxu0 %v1402_v1 }
  0xf1   : > { %801 = vrot.lane.b32.xlu1 %v563_v24, %s1404_s22  ;;  %681 = vrot.lane.b32.xlu0 %v563_v24, %s1405_s23  ;;  %s1412_s22 = smov 16   ;;  %s1413_s23 = smov 24  }
  0xf5   : > { %921 = vrot.lane.b32.xlu1 %v563_v24, %s1406_s24  ;;  %923 = vrot.lane.b32.xlu0 %v1532_v23, %s1406_s24 }
  0xf6   : > { %1297 = vmatmul.mubr.msk.bf16.vlgmr.msra.gmra.mrb[4].mxu0 %vm565_vm2, %v563_v24 }
  0xf7   : > { %1308 = vmatprep.mubr.msk.bf16.mxu0 %vm1403_vm0, %v1402_v1 }
 0x15f   : > { %v684_v26 = vpop.permute.xlu0 %683  ;;  %v804_v28 = vpop.permute.xlu1 %803 }
 0x160   : > { %v689_v27 = vsel %vm565_vm2, %v684_v26, 0  ;;  %v809_v30 = vsel %vm565_vm2, %v804_v28, 0 }
 0x161   : > { %1307 = vmatpush3.bf16.xpose.msra.mxu0 %v689_v27 }
 0x162   : > { %1318 = vmatprep.subr.bf16.mxu0 %v1402_v1 }
 0x163   : > { %v682_v29 = vpop.permute.xlu0 %681  ;;  %v802_v32 = vpop.permute.xlu1 %801 }
 0x167   : > { %v924_v31 = vpop.permute.xlu0 %923  ;;  %v922_v34 = vpop.permute.xlu1 %921 }
 0x168   : > { %1309 = vmatmul.mubr.msk.bf16.vlgmr.msra.gmra.mrb[8].mxu0 %vm565_vm2, %v682_v29  ;;  %v929_v33 = vsel %vm565_vm2, %v924_v31, 0 }
 0x169   : > { %1319 = vmatpush3.bf16.xpose.msra.mxu0 %v809_v30  ;;  %1320 = vmatprep.mubr.msk.bf16.mxu0 %vm1403_vm0, %v1402_v1 }
 0x16a   : > { %1330 = vmatprep.subr.bf16.mxu0 %v1402_v1 }
 0x170   : > { %1321 = vmatmul.mubr.msk.bf16.vlgmr.msra.gmra.mrb[12].mxu0 %vm565_vm2, %v802_v32 }
 0x171   : > { %1331 = vmatpush3.bf16.xpose.msra.mxu0 %v929_v33  ;;  %1332 = vmatprep.mubr.msk.bf16.mxu0 %vm1403_vm0, %v1402_v1 }
 0x172   : > { %1342 = vmatprep.subr.bf16.mxu0 %v1402_v1 }
 0x178   : > { %1333 = vmatmul.mubr.msk.bf16.vlgmr.msra.gmra.mrb[16].mxu0 %vm565_vm2, %v922_v34 }
 0x179   : > { %1346 = vmatprep.mubr.msk.bf16.mxu0 %vm1403_vm0, %v1402_v1 }
 0x1c9   : > { %v606_v38 = vpop.f32.mrb[4].mxu0 }
 0x1ca   : > { %v612_v39 = vsel %vm428_vm3, %v606_v38, -1e+09  ;;  %v1298_v40 = vpop.f32.mrb[5].mxu0 }
 0x1cb   : > { %v609_v41 = vpop.f32.mrb[6].mxu0  ;;  %v614_v42 = vsel %vm613_vm4, %v612_v39, -inf }
 0x1cc   : > { %615 = vmax.xlane.f32.xlu0 %v614_v42  ;;  %v1299_v43 = vpop.f32.mrb[7].mxu0 }
 0x23b   : > { %v725_v44 = vpop.f32.mrb[8].mxu0 }
 0x23c   : > { %v731_v45 = vsel %vm428_vm3, %v725_v44, -1e+09  ;;  %v1310_v46 = vpop.f32.mrb[9].mxu0 }
 0x23d   : > { %v728_v47 = vpop.f32.mrb[10].mxu0  ;;  %v732_v48 = vsel %vm613_vm4, %v731_v45, -inf }
 0x23e   : > { %733 = vmax.xlane.f32.xlu1 %v732_v48  ;;  %v1311_v49 = vpop.f32.mrb[11].mxu0 }
 0x243   : > { %v845_v50 = vpop.f32.mrb[12].mxu0 }
 0x244   : > { %v851_v51 = vsel %vm428_vm3, %v845_v50, -1e+09  ;;  %v1322_v52 = vpop.f32.mrb[13].mxu0 }
 0x245   : > { %v848_v53 = vpop.f32.mrb[14].mxu0  ;;  %v852_v54 = vsel %vm613_vm4, %v851_v51, -inf }
 0x246   : > { %853 = vmax.xlane.f32.xlu0 %v852_v54  ;;  %v1323_v55 = vpop.f32.mrb[15].mxu0 }
 0x24b   : > { %v965_v56 = vpop.f32.mrb[16].mxu0 }
 0x24c   : > { %v971_v57 = vsel %vm428_vm3, %v965_v56, -1e+09  ;;  %v1334_v58 = vpop.f32.mrb[17].mxu0 }
 0x24d   : > { %v968_v59 = vpop.f32.mrb[18].mxu0  ;;  %v972_v60 = vsel %vm613_vm4, %v971_v57, -inf }
 0x24e   : > { %973 = vmax.xlane.f32.xlu0 %v972_v60  ;;  %v1335_v61 = vpop.f32.mrb[19].mxu0 }
 0x259   : > { %v616_v62 = vpop.xlane.xlu0 %615 }
 0x25a   : > { %v617_v63 = vsub.f32 %v612_v39, %v616_v62 }
 0x25c   : > { %v618_v0 = vmul.f32 1.442695, %v617_v63 }
 0x25e   : > { %1376 = vpow2.f32 %v618_v0  ;;  %v1374_v0 = vld [vmem:[%s1632_s7] sm:$0xff]  }
 0x25f   : > { %1343 = vmatpush3.bf16.msra.mxu0 %v1374_v0 }
 0x260   : > { %1344 = vmatprep.subr.bf16.mxu0 %v1402_v1 }
 0x268   : > { %v1377_v2 = vpop.eup %1376 }
 0x269   : > { %v620_v3 = vsel %vm613_vm4, %v1377_v2, 0.0 }
 0x26a   : > { %621 = vadd.xlane.f32.xlu1 %v620_v3 }
 0x27b   : > { %630 = vrot.lane.b32.xlu1 %v1532_v23, %s1407_s30 }
 0x2cb   : > { %v734_v4 = vpop.xlane.xlu1 %733 }
 0x2cc   : > { %v735_v5 = vsub.f32 %v731_v45, %v734_v4 }
 0x2ce   : > { %v736_v6 = vmul.f32 1.442695, %v735_v5 }
 0x2d0   : > { %1378 = vpow2.f32 %v736_v6 }
 0x2d3   : > { %v854_v8 = vpop.xlane.xlu0 %853 }
 0x2d4   : > { %v855_v9 = vsub.f32 %v851_v51, %v854_v8 }
 0x2d6   : > { %v856_v10 = vmul.f32 1.442695, %v855_v9 }
 0x2d8   : > { %1380 = vpow2.f32 %v856_v10 }
 0x2da   : > { %v1379_v11 = vpop.eup %1378 }
 0x2db   : > { %v974_v12 = vpop.xlane.xlu0 %973  ;;  %v738_v13 = vsel %vm613_vm4, %v1379_v11, 0.0 }
 0x2dc   : > { %v975_v14 = vsub.f32 %v971_v57, %v974_v12  ;;  %739 = vadd.xlane.f32.xlu0 %v738_v13 }
 0x2de   : > { %v976_v15 = vmul.f32 1.442695, %v975_v14 }
 0x2e0   : > { %1382 = vpow2.f32 %v976_v15 }
 0x2e2   : > { %v1381_v16 = vpop.eup %1380 }
 0x2e3   : > { %v858_v17 = vsel %vm613_vm4, %v1381_v16, 0.0 }
 0x2e4   : > { %859 = vadd.xlane.f32.xlu1 %v858_v17 }
 0x2ea   : > { %v1383_v18 = vpop.eup %1382 }
 0x2eb   : > { %v978_v19 = vsel %vm613_vm4, %v1383_v18, 0.0 }
 0x2ec   : > { %979 = vadd.xlane.f32.xlu0 %v978_v19 }
 0x2f5   : > { %867 = vrot.lane.b32.xlu1 %v1532_v23, %s1408_s12 }
 0x2f7   : > { %v622_v20 = vpop.xlane.xlu1 %621 }
 0x2f8   : > { %1384 = vrcp.f32 %v622_v20 }
 0x2f9   : > { %987 = vrot.lane.b32.xlu1 %v1532_v23, %s1409_s13 }
 0x2fb   : > { %v631_v21 = vpop.permute.xlu1 %630 }
 0x2fc   : > { %v637_v22 = vsel %vm635_vm5, %v631_v21, 0 }
 0x2fd   : > { %1301 = vmatpush3.bf16.msra.mxu1 %v637_v22 }
 0x2fe   : > { %1312 = vmatprep.subr.bf16.mxu1 %v1402_v1 }
 0x302   : > { %v1385_v24 = vpop.eup %1384  ;;  %747 = vrot.lane.b32.xlu0 %v1532_v23, %s1410_s14  ;;  %s418_s14 = scalar_lea.vmem %s1636_s11, %s1223_s28 }
 0x303   : > { %v624_v25 = vmul.f32 %v1385_v24, %v622_v20 }
 0x305   : > { %v625_v26 = vsub.f32 2.0, %v624_v25 }
 0x307   : > { %v626_v27 = vmul.f32 %v1385_v24, %v625_v26 }
 0x309   : > { %v627_v28 = vmul.f32 %v1377_v2, %v626_v27  ;;  %v1375_v2 = vld [vmem:[%s1632_s7 + $0x8] sm:$0xff]  }
 0x30a   : > { %1345 = vmatpush3.bf16.msra.mxu0 %v1375_v2 }
 0x30b   : > { %v628_v29 = vpack.c.bf16 %v627_v28, %v627_v28 }
 0x30d   : > { %1303 = vmatmul.mubr.msk.bf16.vlgmr.msra.gmra.mrb[4].mxu1 %vm613_vm4, %v628_v29 }
 0x30e   : > { %1314 = vmatprep.mubr.msk.bf16.mxu1 %vm1403_vm0, %v1402_v1 }
 0x369   : > { %v740_v30 = vpop.xlane.xlu0 %739 }
 0x36a   : > { %1386 = vrcp.f32 %v740_v30 }
 0x371   : > { %v860_v31 = vpop.xlane.xlu1 %859 }
 0x372   : > { %1388 = vrcp.f32 %v860_v31 }
 0x374   : > { %v1387_v32 = vpop.eup %1386 }
 0x375   : > { %v742_v33 = vmul.f32 %v1387_v32, %v740_v30  ;;  %v868_v42 = vpop.permute.xlu1 %867 }
 0x376   : > { %v873_v45 = vsel %vm635_vm5, %v868_v42, 0 }
 0x377   : > { %v743_v34 = vsub.f32 2.0, %v742_v33 }
 0x379   : > { %v744_v35 = vmul.f32 %v1387_v32, %v743_v34  ;;  %v980_v36 = vpop.xlane.xlu0 %979  ;;  %v988_v49 = vpop.permute.xlu1 %987 }
 0x37a   : > { %1390 = vrcp.f32 %v980_v36  ;;  %v993_v53 = vsel %vm635_vm5, %v988_v49, 0 }
 0x37b   : > { %v745_v37 = vmul.f32 %v1379_v11, %v744_v35  ;;  %v1249_v35 = vld [vmem:[%s1635_s10] ss:$0 sm:$0xff] }
 0x37c   : > { %v1389_v23 = vpop.eup %1388 }
 0x37d   : > { %v862_v38 = vmul.f32 %v1389_v23, %v860_v31  ;;  %v748_v39 = vpop.permute.xlu0 %747  ;;  %v746_v43 = vpack.c.bf16 %v745_v37, %v745_v37 }
 0x37e   : > { %v753_v40 = vsel %vm635_vm5, %v748_v39, 0 }
 0x37f   : > { %v863_v41 = vsub.f32 2.0, %v862_v38  ;;  %1313 = vmatpush3.bf16.msra.mxu1 %v753_v40 }
 0x380   : > { %1324 = vmatprep.subr.bf16.mxu1 %v1402_v1 }
 0x381   : > { %v864_v44 = vmul.f32 %v1389_v23, %v863_v41 }
 0x382   : > { %1315 = vmatmul.mubr.msk.bf16.vlgmr.msra.gmra.mrb[8].mxu1 %vm613_vm4, %v746_v43 }
 0x383   : > { %1325 = vmatpush3.bf16.msra.mxu1 %v873_v45  ;;  %1326 = vmatprep.mubr.msk.bf16.mxu1 %vm1403_vm0, %v1402_v1  ;;  %v865_v47 = vmul.f32 %v1381_v16, %v864_v44  ;;  %v1244_v16 = vld [vmem:[%s1633_s8] ss:$0 sm:$0xff] }
 0x384   : > { %v1391_v46 = vpop.eup %1390  ;;  %1336 = vmatprep.subr.bf16.mxu1 %v1402_v1 }
 0x385   : > { %v982_v48 = vmul.f32 %v1391_v46, %v980_v36  ;;  %v866_v51 = vpack.c.bf16 %v865_v47, %v865_v47 }
 0x387   : > { %v983_v50 = vsub.f32 2.0, %v982_v48 }
 0x389   : > { %v984_v52 = vmul.f32 %v1391_v46, %v983_v50 }
 0x38a   : > { %1327 = vmatmul.mubr.msk.bf16.vlgmr.msra.gmra.mrb[12].mxu1 %vm613_vm4, %v866_v51 }
 0x38b   : > { %1337 = vmatpush3.bf16.msra.mxu1 %v993_v53  ;;  %1338 = vmatprep.mubr.msk.bf16.mxu1 %vm1403_vm0, %v1402_v1  ;;  %v985_v54 = vmul.f32 %v1383_v18, %v984_v52 }
 0x38d   : > { %v986_v55 = vpack.c.bf16 %v985_v54, %v985_v54 }
 0x392   : > { %1339 = vmatmul.mubr.msk.bf16.vlgmr.msra.gmra.mrb[16].mxu1 %vm613_vm4, %v986_v55 }
 0x3e0   : > { %v673_v56 = vpop.f32.mrb[4].mxu1 }
 0x3e1   : > { %679 = vst.msk [vmem:[#allocation2] sm:$0xff] %vm565_vm2, %v673_v56  ;;  %v1304_v57 = vpop.f32.mrb[5].mxu1 }
 0x3e2   : > { %v676_v58 = vpop.f32.mrb[6].mxu1 }
 0x3e3   : > { %v1305_v59 = vpop.f32.mrb[7].mxu1 }
 0x455   : > { %v789_v60 = vpop.f32.mrb[8].mxu1 }
 0x456   : > { %796 = vrot.lane.b32.xlu0 %v789_v60, %s1411_s15  ;;  %v1316_v61 = vpop.f32.mrb[9].mxu1 }
 0x457   : > { %v792_v62 = vpop.f32.mrb[10].mxu1 }
 0x458   : > { %v1317_v63 = vpop.f32.mrb[11].mxu1 }
 0x45d   : > { %v909_v3 = vpop.f32.mrb[12].mxu1 }
 0x45e   : > { %916 = vrot.lane.b32.xlu1 %v909_v3, %s1412_s22  ;;  %v1328_v4 = vpop.f32.mrb[13].mxu1 }
 0x45f   : > { %v912_v5 = vpop.f32.mrb[14].mxu1 }
 0x460   : > { %v1329_v6 = vpop.f32.mrb[15].mxu1 }
 0x465   : > { %v1029_v8 = vpop.f32.mrb[16].mxu1 }
 0x466   : > { %1036 = vrot.lane.b32.xlu0 %v1029_v8, %s1413_s23  ;;  %v1340_v9 = vpop.f32.mrb[17].mxu1 }
 0x467   : > { %v1032_v10 = vpop.f32.mrb[18].mxu1 }
 0x468   : > { %v1341_v11 = vpop.f32.mrb[19].mxu1 }
 0x4c8   : > { %v797_v12 = vpop.permute.xlu0 %796 }
 0x4c9   : > { %800 = vst.msk [vmem:[#allocation2] sm:$0xff] %vm799_vm6, %v797_v12 }
 0x4d0   : > { %v917_v13 = vpop.permute.xlu1 %916 }
 0x4d1   : > { %920 = vst.msk [vmem:[#allocation2] sm:$0xff] %vm919_vm7, %v917_v13 }
 0x4d8   : > { %v1037_v1 = vpop.permute.xlu0 %1036 }
 0x4d9   : > { %1040 = vst.msk [vmem:[#allocation2] sm:$0xff] %vm1039_vm8, %v1037_v1 }
 0x4e0   : > { %v1041_v14 = vld [vmem:[#allocation2] sm:$0xff] }
 0x4e1   : > { %v1042_v15 = vpack.c.bf16 %v1041_v14, %v1041_v14 }
 0x4e3   : > { %1347 = vmatmul.mubr.msk.bf16.vlgmr.msra.gmra.mrb[20].mxu0 %vm452_vm1, %v1042_v15 }
 0x5b6   : > { %v1103_v17 = vpop.f32.mrb[20].mxu0 }
 0x5b7   : > { %v1104_v18 = vadd.f32 %v1244_v16, %v1103_v17  ;;  %v1348_v19 = vpop.f32.mrb[21].mxu0 }
 0x5b8   : > { %v1106_v20 = vpop.f32.mrb[22].mxu0 }
 0x5b9   : > { %v1349_v21 = vpop.f32.mrb[23].mxu0  ;;  %v1109_v22 = vadd.f32 %v1104_v18, %v1515_v7  ;;  %v1248_v7 = vld [vmem:[%s1634_s9] ss:$0 sm:$0xff] }
 0x5bb   : > { %v1110_v24 = vsel %vm452_vm1, %v1109_v22, 0.0 }
 0x5bc   : > { %1111 = vadd.xlane.f32.xlu1 %v1110_v24 }
 0x649   : > { %v1112_v25 = vpop.xlane.xlu1 %1111 }
 0x64a   : > { %v1114_v26 = vmul.f32 0.03125, %v1112_v25 }
 0x64c   : > { %v1115_v27 = vsub.f32 %v1109_v22, %v1114_v26 }
 0x64e   : > { %v1116_v28 = vmul.f32 %v1115_v27, %v1115_v27 }
 0x650   : > { %v1117_v29 = vsel %vm452_vm1, %v1116_v28, 0.0 }
 0x651   : > { %1118 = vadd.xlane.f32.xlu0 %v1117_v29 }
 0x6de   : > { %v1119_v30 = vpop.xlane.xlu0 %1118 }
 0x6df   : > { %v1120_v31 = vmul.f32 0.03125, %v1119_v30 }
 0x6e1   : > { %v1121_v32 = vadd.f32 1e-06, %v1120_v31 }
 0x6e3   : > { %1392 = vrsqrt.f32 %v1121_v32 }
 0x6ed   : > { %v1393_v33 = vpop.eup %1392 }
 0x6ee   : > { %v1123_v34 = vmul.f32 %v1393_v33, %v1115_v27 }
 0x6f0   : > { %v1131_v36 = vmul.f32 %v1248_v7, %v1123_v34 }
 0x6f2   : > { %v1139_v23 = vadd.f32 %v1249_v35, %v1131_v36 }
 0x6f4   : > { %1140 = vst.msk [vmem:[%s418_s14] sm:$0xff] %vm452_vm1, %v1139_v23 }
 0x6f5 PF: > { %s21_s17 = sadd.s32 1, %s1400_s17  }
 0x6f6   : > { %p18_p4 = scmp.ge.s32.totalorder %s21_s17, 4  }
 0x6f8   :  { %20 = sbr.rel (!%p18_p4) target bundleno = 1 (0x1), region = 100 }

// kernel: decoder_layer_forward.3
= control target key start
LH: loop header
LB: loop body
LE: loop exit
PB: predicated region body
PF: predicated region fallthrough
CT: control target
= control target key end

     0   :  { %16 = vsyncpa [#allocation4], 0  ;;  %s2089_s0 = inlined_call_operand.vmem [shape: f32[2,8,32], index: 0, kind: input, shape index: {}, may-alias: {0,1}]   ;;  %s2090_s1 = inlined_call_operand.vmem [shape: f32[2,8,32], index: 1, kind: input, shape index: {}, may-alias: {0,1}]   ;;  %s2091_s2 = inlined_call_operand.vmem [shape: s8[2,8,8], index: 2, kind: input, shape index: {}]   ;;  %s2092_s3 = inlined_call_operand.vmem [shape: bf16[32,32], index: 3, kind: input, shape index: {}]   ;;  %s2093_s4 = inlined_call_operand.vmem [shape: f32[1,32], index: 4, kind: input, shape index: {}]   ;;  %s2094_s5 = inlined_call_operand.vmem [shape: bf16[32,64], index: 5, kind: input, shape index: {}]   ;;  %s2095_s6 = inlined_call_operand.hbm [shape: f32[1,64], index: 6, kind: input, shape index: {}]   ;;  %s2096_s7 = inlined_call_operand.hbm [shape: bf16[32,32], index: 7, kind: input, shape index: {}]   ;;  %s2097_s8 = inlined_call_operand.hbm [shape: f32[1,32], index: 8, kind: input, shape index: {}]   ;;  %s2098_s9 = inlined_call_operand.hbm [shape: f32[1,32], index: 9, kind: input, shape index: {}]   ;;  %s2099_s10 = inlined_call_operand.hbm [shape: f32[1,32], index: 10, kind: input, shape index: {}]   ;;  %s2100_s11 = inlined_call_operand.vmem [shape: f32[2,8,32], index: 11, kind: output, shape index: {}]  }
   0x1   :  { %17 = vsyncpa [#allocation6], 0 }
   0x2   :  { %18 = vsyncpa [#allocation9], 0  ;;  %s1803_s17 = smov 0  }
   0x3 LB: > { %2104 = sst [smem:[#allocation14_spill]] %s1722_s17  ;;  %s1724_s18 = smov [#allocation5]   ;;  %s1722_s17 = sphi %s1803_s17, %s24_s17  }
   0x4   : > { %s333_s19 = sshll.u32 %s1724_s18, 4  ;;  %s1809_s20 = sadd.s32 4294967295, %s1722_s17   ;;  %s1814_s19 = int_to_ptr.vmem [resolvable:$true] %s333_s19 }
   0x5   : > { %p1329_p0 = scmp.ge.s32.totalorder %s1722_s17, 1  ;;  %p301_p1 = scmp.lt.s32.totalorder %s1722_s17, 3 }
   0x6   : > { %p2102_p2 = scmp.eq.s32.totalorder %s1809_s20, 0  ;;  %s1725_s22 = smov [#allocation8]  }
   0x7   : > { %p1816_p3 = pnand %p1329_p0, %p301_p1  ;;  %s358_s23 = sshll.u32 %s1725_s22, 4  ;;  %s1822_s23 = int_to_ptr.vmem [resolvable:$true] %s358_s23 }
   0x8   : > { %s1726_s25 = smov [#allocation3]   ;;  %s1727_s27 = smov [#allocation7]  }
   0x9   : > { %s2105_s21 = scalar_select %p1816_p3, 1, 0 }
   0xa   : > { %p1487_p4 = pneg %p1816_p3  ;;  %s323_s26 = sshll.u32 %s1726_s25, 4  ;;  %s1830_s26 = int_to_ptr.vmem [resolvable:$true] %s323_s26 }
   0xb   : > { %s1832_s28 = sshll.u32 %s1727_s27, 4  ;;  %s1564_s12 = scalar_lea.hbm %s2096_s7, 256  ;;  %s348_s28 = int_to_ptr.vmem [resolvable:$true] %s1832_s28 }
   0xc   : > { %p1826_p5 = pnand %p2102_p2, %p1487_p4  ;;  %p1565_p6 = scmp.ne.s32.totalorder %s2096_s7, %s1564_s12 }
   0xd   : > { %p1571_p10 = scmp.lt.u32.totalorder %s1564_s12, %s2096_s7 }
   0xe   : > { %p1842_p7 = pneg %p1826_p5 }
  0x10   : > { %p1567_p8 = pnand %p1842_p7, %p1565_p6 }
  0x12   : > { %p1568_p9 = pneg %p1567_p8 }
  0x14   : > { %p1573_p11 = pnand %p1571_p10, %p1568_p9 }
  0x16   : > { %1576 = shalt.err (!%p1573_p11)
}
  0x17   : > { %s1577_s22 = scalar_lea.vmem %s1814_s19, 256  ;;  %p1585_p1 = scmp.lt.s32.totalorder %s1814_s19, %s1814_s19 }
  0x18   : > { %p1578_p12 = scmp.ne.s32.totalorder %s1814_s19, %s1577_s22  ;;  %p1586_p4 = scmp.lt.s32.totalorder %s1577_s22, %s1577_s22 }
  0x1a   : > { %p1580_p13 = pnand %p1578_p12, %p1842_p7  ;;  %p1587_p6 = por %p1586_p4, %p1585_p1 }
  0x1c   : > { %p1581_p0 = pneg %p1580_p13 }
  0x1e   : > { %p1588_p8 = pnand %p1587_p6, %p1581_p0 }
  0x20   : > { %1591 = shalt.err (!%p1588_p8)
}
  0x21   : > { %s1728_s25 = smov 64   ;;  %s1729_s27 = smov 4  }
  0x22   : > { %1493 = dma.hbm_to_vmem [thread:$0]  (!%p1826_p5), %s2096_s7, 256, %s1814_s19, [#allocation6], %s1728_s25, %s1728_s25, %s1729_s27  }
  0x23   : > { %s1592_s14 = scalar_lea.hbm %s2098_s9, 16 }
  0x24   : > { %p1593_p9 = scmp.ne.s32.totalorder %s2098_s9, %s1592_s14  ;;  %p1599_p12 = scmp.lt.u32.totalorder %s1592_s14, %s2098_s9 }
  0x26   : > { %p1595_p10 = pnand %p1593_p9, %p1842_p7 }
  0x28   : > { %p1596_p11 = pneg %p1595_p10 }
  0x2a   : > { %p1601_p13 = pnand %p1599_p12, %p1596_p11 }
  0x2c   : > { %1604 = shalt.err (!%p1601_p13)
}
  0x2d   : > { %s1605_s19 = scalar_lea.vmem %s1822_s23, 16  ;;  %s1612_s25 = scalar_lea.vmem %s1822_s23, 32 }
  0x2e   : > { %p1606_p0 = scmp.ne.s32.totalorder %s1822_s23, %s1605_s19  ;;  %p1613_p6 = scmp.lt.s32.totalorder %s1822_s23, %s1822_s23 }
  0x2f   : > { %p1614_p8 = scmp.lt.s32.totalorder %s1612_s25, %s1605_s19 }
  0x30   : > { %p1608_p1 = pnand %p1606_p0, %p1842_p7 }
  0x31   : > { %p1615_p9 = por %p1614_p8, %p1613_p6 }
  0x32   : > { %p1609_p4 = pneg %p1608_p1 }
  0x34   : > { %p1616_p10 = pnand %p1615_p9, %p1609_p4 }
  0x36   : > { %1619 = shalt.err (!%p1616_p10)
}
  0x37   : > { %1499 = dma.hbm_to_vmem [thread:$0]  (!%p1826_p5), %s2098_s9, 16, %s1822_s23, [#allocation9]  }
  0x38   : > { %s1620_s12 = scalar_lea.hbm %s2095_s6, 16 }
  0x39   : > { %p1621_p11 = scmp.ne.s32.totalorder %s2095_s6, %s1620_s12  ;;  %p1627_p0 = scmp.lt.u32.totalorder %s1620_s12, %s2095_s6 }
  0x3b   : > { %p1623_p12 = pnand %p1621_p11, %p1842_p7 }
  0x3d   : > { %p1624_p13 = pneg %p1623_p12 }
  0x3f   : > { %p1629_p1 = pnand %p1627_p0, %p1624_p13 }
  0x41   : > { %1632 = shalt.err (!%p1629_p1)
}
  0x42   : > { %s1633_s23 = scalar_lea.vmem %s1830_s26, 16  ;;  %s1640_s22 = scalar_lea.vmem %s1830_s26, 32 }
  0x43   : > { %p1634_p4 = scmp.ne.s32.totalorder %s1830_s26, %s1633_s23  ;;  %p1641_p9 = scmp.lt.s32.totalorder %s1830_s26, %s1830_s26 }
  0x44   : > { %p1642_p10 = scmp.lt.s32.totalorder %s1640_s22, %s1633_s23 }
  0x45   : > { %p1636_p6 = pnand %p1634_p4, %p1842_p7 }
  0x46   : > { %p1643_p11 = por %p1642_p10, %p1641_p9 }
  0x47   : > { %p1637_p8 = pneg %p1636_p6 }
  0x49   : > { %p1644_p12 = pnand %p1643_p11, %p1637_p8 }
  0x4b   : > { %1647 = shalt.err (!%p1644_p12)
}
  0x4c   : > { %1490 = dma.hbm_to_vmem [thread:$0]  (!%p1826_p5), %s2095_s6, 16, %s1830_s26, [#allocation4]  }
  0x4d   : > { %s1648_s29 = scalar_lea.hbm %s2097_s8, 16 }
  0x4e   : > { %p1649_p13 = scmp.ne.s32.totalorder %s2097_s8, %s1648_s29  ;;  %p1655_p4 = scmp.lt.u32.totalorder %s1648_s29, %s2097_s8 }
  0x50   : > { %p1651_p0 = pnand %p1649_p13, %p1842_p7 }
  0x52   : > { %p1652_p1 = pneg %p1651_p0 }
  0x54   : > { %p1657_p6 = pnand %p1655_p4, %p1652_p1 }
  0x56   : > { %1660 = shalt.err (!%p1657_p6)
}
  0x57   : > { %s1661_s16 = scalar_lea.vmem %s348_s28, 16  ;;  %s1668_s26 = scalar_lea.vmem %s348_s28, 32 }
  0x58   : > { %p1662_p8 = scmp.ne.s32.totalorder %s348_s28, %s1661_s16  ;;  %p1669_p11 = scmp.lt.s32.totalorder %s348_s28, %s348_s28 }
  0x59   : > { %p1670_p12 = scmp.lt.s32.totalorder %s1668_s26, %s1661_s16 }
  0x5a   : > { %p1664_p9 = pnand %p1662_p8, %p1842_p7 }
  0x5b   : > { %p1671_p2 = por %p1670_p12, %p1669_p11 }
  0x5c   : > { %p1665_p10 = pneg %p1664_p9 }
  0x5e   : > { %p1672_p3 = pnand %p1671_p2, %p1665_p10 }
  0x60   : > { %1675 = shalt.err (!%p1672_p3)
}
  0x61   : > { %1496 = dma.hbm_to_vmem [thread:$0]  (!%p1826_p5), %s2097_s8, 16, %s348_s28, [#allocation6]  }
  0x62   : > { %s1730_s22 = smov [#allocation10]   ;;  %s1676_s27 = scalar_lea.hbm %s2099_s10, 16 }
  0x63   : > { %s369_s19 = sshll.u32 %s1730_s22, 4  ;;  %p1677_p13 = scmp.ne.s32.totalorder %s2099_s10, %s1676_s27  ;;  %s370_s19 = int_to_ptr.vmem [resolvable:$true] %s369_s19 }
  0x64   : > { %p1683_p0 = scmp.lt.u32.totalorder %s1676_s27, %s2099_s10 }
  0x65   : > { %p1679_p2 = pnand %p1677_p13, %p1842_p7 }
  0x67   : > { %p1680_p3 = pneg %p1679_p2 }
  0x69   : > { %p1685_p1 = pnand %p1683_p0, %p1680_p3 }
  0x6b   : > { %1688 = shalt.err (!%p1685_p1)
}
  0x6c   : > { %s1689_s28 = scalar_lea.vmem %s370_s19, 16  ;;  %s1696_s14 = scalar_lea.vmem %s370_s19, 32 }
  0x6d   : > { %p1690_p4 = scmp.ne.s32.totalorder %s370_s19, %s1689_s28  ;;  %p1697_p9 = scmp.lt.s32.totalorder %s370_s19, %s370_s19 }
  0x6e   : > { %p1698_p10 = scmp.lt.s32.totalorder %s1696_s14, %s1689_s28 }
  0x6f   : > { %p1692_p6 = pnand %p1690_p4, %p1842_p7 }
  0x70   : > { %p1699_p11 = por %p1698_p10, %p1697_p9 }
  0x71   : > { %p1693_p8 = pneg %p1692_p6 }
  0x73   : > { %p1700_p12 = pnand %p1699_p11, %p1693_p8 }
  0x75   : > { %1703 = shalt.err (!%p1700_p12)
}
  0x76   : > { %1502 = dma.hbm_to_vmem [thread:$0]  (!%p1826_p5), %s2099_s10, 16, %s370_s19, [#allocation9]  }
  0x77   : > { %p2108_p13 = scmp.ne.s32.totalorder %s2105_s21, 0 }
  0x78   : > { %p2109_p2 = scmp.eq.s32.totalorder (!%p2108_p13), %s1809_s20, 0 }
  0x79   : > { %403 = sbr.rel (%p2108_p13) target bundleno = 1906 (0x772), region = 64 }
  0x80   : > { %1709 = dma.done.wait (%p2109_p2), [#allocation4], 16   ;;  %p2110_p7 = pmov %p2109_p2 }
  0x81   : > { %p2111_p3 = pmov %p2109_p2 }
  0x82   : > { %1711 = vsyncadd (%p2110_p7), [#allocation4], 4294967280 }
  0x83   : > { %1713 = dma.done.wait (%p2111_p3), [#allocation6], 272   ;;  %p2112_p0 = pmov %p2109_p2 }
  0x85   : > { %1715 = vsyncadd (%p2112_p0), [#allocation6], 4294967024  ;;  %p2113_p1 = pmov %p2112_p0 }
  0x86   : > { %p2114_p5 = pmov %p2112_p0 }
  0x87   : > { %1717 = dma.done.wait (%p2113_p1), [#allocation9], 32  }
  0x88   : > { %1719 = vsyncadd (%p2114_p5), [#allocation9], 4294967264  ;;  %p465_p4 = scmp.lt.s32.totalorder %s1809_s20, 1  ;;  %v1731_v0 = vmov 0.0   ;;  %vm1732_vm0 = vmmov 0   ;;  %v1540_v1 = vld [vmem:[%s2094_s5] sm:$0xff]  }
  0x89   : > { %1403 = vmatprep.subr.bf16.mxu1 %v1731_v0  ;;  %1395 = vmatprep.subr.bf16.mxu0 %v1731_v0  ;;  %v1541_v2 = vld [vmem:[%s2092_s3] sm:$0xff]   ;;  %v1542_v3 = vld [vmem:[%s2094_s5 + $0x8] sm:$0xff]   ;;  %vm513_vm1 = vcmask 261120   ;;  %vm625_vm2 = vcmask 64512   ;;  %s1733_s26 = smov 112   ;;  %s1734_s24 = smov 120  }
  0x8a   : > { %1407 = vmatprep.mubr.msk.bf16.mxu1 %vm1732_vm0, %v1731_v0  ;;  %s2117_s20 = smov (!%p465_p4, %s1809_s20), 1  ;;  %1399 = vmatprep.mubr.msk.bf16.mxu0 %vm1732_vm0, %v1731_v0  ;;  %v1543_v5 = vld [vmem:[%s2092_s3 + $0x8] sm:$0xff]   ;;  %v1346_v10 = vld [vmem:[%s2093_s4] ss:$0 sm:$0xff]  ;;  %s1735_s15 = smov 104   ;;  %vm694_vm4 = vcmask 1043456  }
  0x8b   : > { %s1973_s21 = sshll.u32 %s2117_s20, 3  ;;  %1404 = vmatpush3.bf16.msra.mxu1 %v1540_v1  ;;  %1396 = vmatpush3.bf16.msra.mxu0 %v1541_v2  ;;  %v1350_v9 = vld [vmem:[#allocation3] ss:$0 sm:$0xff]  ;;  %s1344_s18 = sshll.u32 %s2117_s20, 1  ;;  %vm858_vm5 = vcmask 130112   ;;  %vm978_vm6 = vcmask 195712  }
  0x8c   : > { %s472_s22 = scalar_lea.vmem %s2090_s1, %s1973_s21  ;;  %s468_s29 = scalar_lea.vmem %s2089_s0, %s1973_s21  ;;  %1405 = vmatprep.subr.bf16.mxu1 %v1731_v0  ;;  %1397 = vmatprep.subr.bf16.mxu0 %v1731_v0  ;;  %vm1098_vm7 = vcmask 261312  }
  0x8d   : > { %v484_v4 = vld [vmem:[%s472_s22] sm:$0xff]  ;;  %s476_s19 = scalar_lea.vmem %s2091_s2, %s1344_s18  ;;  %s1736_s20 = smov 96  }
  0x8e   : > { %v1997_v6 = vld [vmem:[%s468_s29] sm:$0xff]  ;;  %v485_v7 = vpack.c.bf16 %v484_v4, %v484_v4  ;;  %s1737_s25 = smov 80   ;;  %s1738_s17 = smov 72  }
  0x8f   : > { %1406 = vmatpush3.bf16.msra.mxu1 %v1542_v3  ;;  %v483_v8 = vpack.c.bf16 %v1997_v6, %v1997_v6  ;;  %1398 = vmatpush3.bf16.msra.mxu0 %v1543_v5  ;;  %v486_v33 = vld [vmem:[%s476_s19] sm:$0x3]  ;;  %s1739_s27 = smov 88   ;;  %s1740_s29 = smov 8  }
  0x90   : > { %1417 = vmatprep.subr.bf16.mxu1 %v1731_v0  ;;  %1411 = vmatprep.subr.bf16.mxu0 %v1731_v0  ;;  %v487_v34 = vunpack.c.0.s8 %v486_v33  ;;  %s1741_s30 = smov 16   ;;  %s1742_s12 = smov 24  }
  0x91   : > { %s480_s14 = scalar_lea.vmem %s2100_s11, %s1973_s21 }
  0x92   : > { %1408 = vmatmul.mubr.msk.bf16.vlgmr.msra.gmra.mrb[0].mxu1 %vm513_vm1, %v485_v7  ;;  %1400 = vmatmul.mubr.msk.bf16.vlgmr.msra.gmra.mrb[0].mxu0 %vm513_vm1, %v483_v8  ;;  %v488_v35 = vcvt.s32.f32 %v487_v34 }
  0x93   : > { %1419 = vmatprep.mubr.msk.bf16.mxu1 %vm1732_vm0, %v1731_v0  ;;  %1413 = vmatprep.mubr.msk.bf16.mxu0 %vm1732_vm0, %v1731_v0 }
  0x94   : > { %vm489_vm3 = vcmp.gt.f32.partialorder %v488_v35, 0.0 }
 0x165   : > { %v617_v11 = vpop.f32.mrb[0].mxu1  ;;  %v551_v14 = vpop.f32.mrb[0].mxu0 }
 0x166   : > { %v618_v12 = vadd.f32 %v1350_v9, %v617_v11  ;;  %v1409_v13 = vpop.f32.mrb[1].mxu1  ;;  %v552_v16 = vadd.f32 %v1346_v10, %v551_v14  ;;  %v1401_v17 = vpop.f32.mrb[1].mxu0 }
 0x167   : > { %v620_v15 = vpop.f32.mrb[2].mxu1  ;;  %v554_v20 = vpop.f32.mrb[2].mxu0 }
 0x168   : > { %v2012_v18 = vpack.c.bf16 %v618_v12, %v618_v12  ;;  %v1410_v19 = vpop.f32.mrb[3].mxu1  ;;  %v1402_v21 = vpop.f32.mrb[3].mxu0  ;;  %v623_v22 = vpack.c.bf16 %v552_v16, %v552_v16 }
 0x16a   : > { %862 = vrot.lane.b32.xlu1 %v2012_v18, %s1733_s26  ;;  %742 = vrot.lane.b32.xlu0 %v2012_v18, %s1734_s24  ;;  %v630_v23 = vsel %vm625_vm2, %v2012_v18, 0 }
 0x16b   : > { %1412 = vmatpush3.bf16.xpose.msra.mxu0 %v630_v23 }
 0x16c   : > { %1423 = vmatprep.subr.bf16.mxu0 %v1731_v0 }
 0x16e   : > { %860 = vrot.lane.b32.xlu1 %v623_v22, %s1733_s26  ;;  %740 = vrot.lane.b32.xlu0 %v623_v22, %s1734_s24 }
 0x172   : > { %980 = vrot.lane.b32.xlu1 %v623_v22, %s1735_s15  ;;  %982 = vrot.lane.b32.xlu0 %v2012_v18, %s1735_s15 }
 0x173   : > { %1414 = vmatmul.mubr.msk.bf16.vlgmr.msra.gmra.mrb[4].mxu0 %vm625_vm2, %v623_v22 }
 0x174   : > { %1425 = vmatprep.mubr.msk.bf16.mxu0 %vm1732_vm0, %v1731_v0 }
 0x1dc   : > { %v743_v24 = vpop.permute.xlu0 %742  ;;  %v863_v26 = vpop.permute.xlu1 %862 }
 0x1dd   : > { %v748_v25 = vsel %vm625_vm2, %v743_v24, 0  ;;  %v868_v28 = vsel %vm625_vm2, %v863_v26, 0 }
 0x1de   : > { %1424 = vmatpush3.bf16.xpose.msra.mxu0 %v748_v25 }
 0x1df   : > { %1435 = vmatprep.subr.bf16.mxu0 %v1731_v0 }
 0x1e0   : > { %v741_v27 = vpop.permute.xlu0 %740  ;;  %v861_v30 = vpop.permute.xlu1 %860 }
 0x1e4   : > { %v983_v29 = vpop.permute.xlu0 %982  ;;  %v981_v32 = vpop.permute.xlu1 %980 }
 0x1e5   : > { %1426 = vmatmul.mubr.msk.bf16.vlgmr.msra.gmra.mrb[8].mxu0 %vm625_vm2, %v741_v27  ;;  %v988_v31 = vsel %vm625_vm2, %v983_v29, 0 }
 0x1e6   : > { %1436 = vmatpush3.bf16.xpose.msra.mxu0 %v868_v28  ;;  %1437 = vmatprep.mubr.msk.bf16.mxu0 %vm1732_vm0, %v1731_v0 }
 0x1e7   : > { %1447 = vmatprep.subr.bf16.mxu0 %v1731_v0 }
 0x1ed   : > { %1438 = vmatmul.mubr.msk.bf16.vlgmr.msra.gmra.mrb[12].mxu0 %vm625_vm2, %v861_v30 }
 0x1ee   : > { %1448 = vmatpush3.bf16.xpose.msra.mxu0 %v988_v31  ;;  %1449 = vmatprep.mubr.msk.bf16.mxu0 %vm1732_vm0, %v1731_v0 }
 0x1ef   : > { %1459 = vmatprep.subr.bf16.mxu0 %v1731_v0 }
 0x1f5   : > { %1450 = vmatmul.mubr.msk.bf16.vlgmr.msra.gmra.mrb[16].mxu0 %vm625_vm2, %v981_v32 }
 0x1f6   : > { %1463 = vmatprep.mubr.msk.bf16.mxu0 %vm1732_vm0, %v1731_v0 }
 0x246   : > { %v666_v36 = vpop.f32.mrb[4].mxu0 }
 0x247   : > { %v672_v37 = vsel %vm489_vm3, %v666_v36, -1e+09  ;;  %v1415_v38 = vpop.f32.mrb[5].mxu0 }
 0x248   : > { %v669_v39 = vpop.f32.mrb[6].mxu0  ;;  %v673_v40 = vsel %vm625_vm2, %v672_v37, -inf }
 0x249   : > { %674 = vmax.xlane.f32.xlu0 %v673_v40  ;;  %v1416_v41 = vpop.f32.mrb[7].mxu0 }
 0x2b8   : > { %v784_v42 = vpop.f32.mrb[8].mxu0 }
 0x2b9   : > { %v790_v43 = vsel %vm489_vm3, %v784_v42, -1e+09  ;;  %v1427_v44 = vpop.f32.mrb[9].mxu0 }
 0x2ba   : > { %v787_v45 = vpop.f32.mrb[10].mxu0  ;;  %v791_v46 = vsel %vm625_vm2, %v790_v43, -inf }
 0x2bb   : > { %792 = vmax.xlane.f32.xlu1 %v791_v46  ;;  %v1428_v47 = vpop.f32.mrb[11].mxu0 }
 0x2c0   : > { %v904_v48 = vpop.f32.mrb[12].mxu0 }
 0x2c1   : > { %v910_v49 = vsel %vm489_vm3, %v904_v48, -1e+09  ;;  %v1439_v50 = vpop.f32.mrb[13].mxu0 }
 0x2c2   : > { %v907_v51 = vpop.f32.mrb[14].mxu0  ;;  %v911_v52 = vsel %vm625_vm2, %v910_v49, -inf }
 0x2c3   : > { %912 = vmax.xlane.f32.xlu0 %v911_v52  ;;  %v1440_v53 = vpop.f32.mrb[15].mxu0 }
 0x2c8   : > { %v1024_v54 = vpop.f32.mrb[16].mxu0 }
 0x2c9   : > { %v1030_v55 = vsel %vm489_vm3, %v1024_v54, -1e+09  ;;  %v1451_v56 = vpop.f32.mrb[17].mxu0 }
 0x2ca   : > { %v1027_v57 = vpop.f32.mrb[18].mxu0  ;;  %v1031_v58 = vsel %vm625_vm2, %v1030_v55, -inf }
 0x2cb   : > { %1032 = vmax.xlane.f32.xlu0 %v1031_v58  ;;  %v1452_v59 = vpop.f32.mrb[19].mxu0 }
 0x2d6   : > { %v675_v60 = vpop.xlane.xlu0 %674 }
 0x2d7   : > { %v676_v61 = vsub.f32 %v672_v37, %v675_v60 }
 0x2d9   : > { %v677_v62 = vmul.f32 1.442695, %v676_v61 }
 0x2db   : > { %1546 = vpow2.f32 %v677_v62  ;;  %v1544_v62 = vld [vmem:[#allocation5] sm:$0xff]  }
 0x2dc   : > { %1460 = vmatpush3.bf16.msra.mxu0 %v1544_v62 }
 0x2dd   : > { %1461 = vmatprep.subr.bf16.mxu0 %v1731_v0 }
 0x2e5   : > { %v1547_v63 = vpop.eup %1546 }
 0x2e6   : > { %v679_v1 = vsel %vm625_vm2, %v1547_v63, 0.0 }
 0x2e7   : > { %680 = vadd.xlane.f32.xlu1 %v679_v1 }
 0x2f8   : > { %689 = vrot.lane.b32.xlu1 %v2012_v18, %s1736_s20 }
 0x348   : > { %v793_v2 = vpop.xlane.xlu1 %792 }
 0x349   : > { %v794_v3 = vsub.f32 %v790_v43, %v793_v2 }
 0x34b   : > { %v795_v4 = vmul.f32 1.442695, %v794_v3 }
 0x34d   : > { %1548 = vpow2.f32 %v795_v4 }
 0x350   : > { %v913_v5 = vpop.xlane.xlu0 %912 }
 0x351   : > { %v914_v7 = vsub.f32 %v910_v49, %v913_v5 }
 0x353   : > { %v915_v8 = vmul.f32 1.442695, %v914_v7 }
 0x355   : > { %1550 = vpow2.f32 %v915_v8 }
 0x357   : > { %v1549_v9 = vpop.eup %1548 }
 0x358   : > { %v1033_v10 = vpop.xlane.xlu0 %1032  ;;  %v797_v11 = vsel %vm625_vm2, %v1549_v9, 0.0 }
 0x359   : > { %v1034_v12 = vsub.f32 %v1030_v55, %v1033_v10  ;;  %798 = vadd.xlane.f32.xlu0 %v797_v11 }
 0x35b   : > { %v1035_v13 = vmul.f32 1.442695, %v1034_v12 }
 0x35d   : > { %1552 = vpow2.f32 %v1035_v13 }
 0x35f   : > { %v1551_v14 = vpop.eup %1550 }
 0x360   : > { %v917_v15 = vsel %vm625_vm2, %v1551_v14, 0.0 }
 0x361   : > { %918 = vadd.xlane.f32.xlu1 %v917_v15 }
 0x367   : > { %v1553_v16 = vpop.eup %1552 }
 0x368   : > { %v1037_v17 = vsel %vm625_vm2, %v1553_v16, 0.0 }
 0x369   : > { %1038 = vadd.xlane.f32.xlu0 %v1037_v17 }
 0x372   : > { %926 = vrot.lane.b32.xlu1 %v2012_v18, %s1737_s25 }
 0x374   : > { %v681_v19 = vpop.xlane.xlu1 %680 }
 0x375   : > { %1554 = vrcp.f32 %v681_v19 }
 0x376   : > { %1046 = vrot.lane.b32.xlu1 %v2012_v18, %s1738_s17 }
 0x378   : > { %v690_v20 = vpop.permute.xlu1 %689 }
 0x379   : > { %v696_v21 = vsel %vm694_vm4, %v690_v20, 0 }
 0x37a   : > { %1418 = vmatpush3.bf16.msra.mxu1 %v696_v21 }
 0x37b   : > { %1429 = vmatprep.subr.bf16.mxu1 %v1731_v0 }
 0x37f   : > { %v1555_v22 = vpop.eup %1554  ;;  %806 = vrot.lane.b32.xlu0 %v2012_v18, %s1739_s27 }
 0x380   : > { %v683_v23 = vmul.f32 %v1555_v22, %v681_v19 }
 0x382   : > { %v684_v24 = vsub.f32 2.0, %v683_v23 }
 0x384   : > { %v685_v25 = vmul.f32 %v1555_v22, %v684_v24 }
 0x386   : > { %v686_v26 = vmul.f32 %v1547_v63, %v685_v25  ;;  %v1545_v63 = vld [vmem:[#allocation5 + $0x8] sm:$0xff]  }
 0x387   : > { %1462 = vmatpush3.bf16.msra.mxu0 %v1545_v63 }
 0x388   : > { %v687_v27 = vpack.c.bf16 %v686_v26, %v686_v26 }
 0x38a   : > { %1420 = vmatmul.mubr.msk.bf16.vlgmr.msra.gmra.mrb[4].mxu1 %vm625_vm2, %v687_v27 }
 0x38b   : > { %1431 = vmatprep.mubr.msk.bf16.mxu1 %vm1732_vm0, %v1731_v0 }
 0x3e6   : > { %v799_v28 = vpop.xlane.xlu0 %798 }
 0x3e7   : > { %1556 = vrcp.f32 %v799_v28 }
 0x3ee   : > { %v919_v29 = vpop.xlane.xlu1 %918 }
 0x3ef   : > { %1558 = vrcp.f32 %v919_v29 }
 0x3f1   : > { %v1557_v30 = vpop.eup %1556 }
 0x3f2   : > { %v801_v31 = vmul.f32 %v1557_v30, %v799_v28  ;;  %v927_v40 = vpop.permute.xlu1 %926 }
 0x3f3   : > { %v932_v43 = vsel %vm694_vm4, %v927_v40, 0 }
 0x3f4   : > { %v802_v32 = vsub.f32 2.0, %v801_v31 }
 0x3f6   : > { %v803_v33 = vmul.f32 %v1557_v30, %v802_v32  ;;  %v1039_v34 = vpop.xlane.xlu0 %1038  ;;  %v1047_v47 = vpop.permute.xlu1 %1046  ;;  %v1366_v32 = vld [vmem:[#allocation8] ss:$0 sm:$0xff] }
 0x3f7   : > { %1560 = vrcp.f32 %v1039_v34  ;;  %v1052_v51 = vsel %vm694_vm4, %v1047_v47, 0 }
 0x3f8   : > { %v804_v35 = vmul.f32 %v1549_v9, %v803_v33 }
 0x3f9   : > { %v1559_v18 = vpop.eup %1558 }
 0x3fa   : > { %v921_v36 = vmul.f32 %v1559_v18, %v919_v29  ;;  %v807_v37 = vpop.permute.xlu0 %806  ;;  %v805_v41 = vpack.c.bf16 %v804_v35, %v804_v35 }
 0x3fb   : > { %v812_v38 = vsel %vm694_vm4, %v807_v37, 0 }
 0x3fc   : > { %v922_v39 = vsub.f32 2.0, %v921_v36  ;;  %1430 = vmatpush3.bf16.msra.mxu1 %v812_v38 }
 0x3fd   : > { %1441 = vmatprep.subr.bf16.mxu1 %v1731_v0 }
 0x3fe   : > { %v923_v42 = vmul.f32 %v1559_v18, %v922_v39 }
 0x3ff   : > { %1432 = vmatmul.mubr.msk.bf16.vlgmr.msra.gmra.mrb[8].mxu1 %vm625_vm2, %v805_v41 }
 0x400   : > { %1442 = vmatpush3.bf16.msra.mxu1 %v932_v43  ;;  %1443 = vmatprep.mubr.msk.bf16.mxu1 %vm1732_vm0, %v1731_v0  ;;  %v924_v45 = vmul.f32 %v1551_v14, %v923_v42  ;;  %v1362_v14 = vld [vmem:[#allocation7] ss:$0 sm:$0xff] }
 0x401   : > { %v1561_v44 = vpop.eup %1560  ;;  %1453 = vmatprep.subr.bf16.mxu1 %v1731_v0 }
 0x402   : > { %v1041_v46 = vmul.f32 %v1561_v44, %v1039_v34  ;;  %v925_v49 = vpack.c.bf16 %v924_v45, %v924_v45  ;;  %v1367_v34 = vld [vmem:[#allocation10] ss:$0 sm:$0xff] }
 0x404   : > { %v1042_v48 = vsub.f32 2.0, %v1041_v46 }
 0x406   : > { %v1043_v50 = vmul.f32 %v1561_v44, %v1042_v48 }
 0x407   : > { %1444 = vmatmul.mubr.msk.bf16.vlgmr.msra.gmra.mrb[12].mxu1 %vm625_vm2, %v925_v49 }
 0x408   : > { %1454 = vmatpush3.bf16.msra.mxu1 %v1052_v51  ;;  %1455 = vmatprep.mubr.msk.bf16.mxu1 %vm1732_vm0, %v1731_v0  ;;  %v1044_v52 = vmul.f32 %v1553_v16, %v1043_v50 }
 0x40a   : > { %v1045_v53 = vpack.c.bf16 %v1044_v52, %v1044_v52 }
 0x40f   : > { %1456 = vmatmul.mubr.msk.bf16.vlgmr.msra.gmra.mrb[16].mxu1 %vm625_vm2, %v1045_v53 }
 0x45d   : > { %v732_v54 = vpop.f32.mrb[4].mxu1 }
 0x45e   : > { %738 = vst.msk [vmem:[#allocation2] sm:$0xff] %vm625_vm2, %v732_v54  ;;  %v1421_v55 = vpop.f32.mrb[5].mxu1 }
 0x45f   : > { %v735_v56 = vpop.f32.mrb[6].mxu1 }
 0x460   : > { %v1422_v57 = vpop.f32.mrb[7].mxu1 }
 0x4d2   : > { %v848_v58 = vpop.f32.mrb[8].mxu1 }
 0x4d3   : > { %855 = vrot.lane.b32.xlu0 %v848_v58, %s1740_s29  ;;  %v1433_v59 = vpop.f32.mrb[9].mxu1 }
 0x4d4   : > { %v851_v60 = vpop.f32.mrb[10].mxu1 }
 0x4d5   : > { %v1434_v61 = vpop.f32.mrb[11].mxu1 }
 0x4da   : > { %v968_v1 = vpop.f32.mrb[12].mxu1 }
 0x4db   : > { %975 = vrot.lane.b32.xlu1 %v968_v1, %s1741_s30  ;;  %v1445_v2 = vpop.f32.mrb[13].mxu1 }
 0x4dc   : > { %v971_v3 = vpop.f32.mrb[14].mxu1 }
 0x4dd   : > { %v1446_v4 = vpop.f32.mrb[15].mxu1 }
 0x4e2   : > { %v1088_v5 = vpop.f32.mrb[16].mxu1 }
 0x4e3   : > { %1095 = vrot.lane.b32.xlu0 %v1088_v5, %s1742_s12  ;;  %v1457_v7 = vpop.f32.mrb[17].mxu1 }
 0x4e4   : > { %v1091_v8 = vpop.f32.mrb[18].mxu1 }
 0x4e5   : > { %v1458_v9 = vpop.f32.mrb[19].mxu1 }
 0x545   : > { %v856_v10 = vpop.permute.xlu0 %855 }
 0x546   : > { %859 = vst.msk [vmem:[#allocation2] sm:$0xff] %vm858_vm5, %v856_v10 }
 0x54d   : > { %v976_v11 = vpop.permute.xlu1 %975 }
 0x54e   : > { %979 = vst.msk [vmem:[#allocation2] sm:$0xff] %vm978_vm6, %v976_v11 }
 0x555   : > { %v1096_v0 = vpop.permute.xlu0 %1095 }
 0x556   : > { %1099 = vst.msk [vmem:[#allocation2] sm:$0xff] %vm1098_vm7, %v1096_v0 }
 0x55d   : > { %v1100_v12 = vld [vmem:[#allocation2] sm:$0xff] }
 0x55e   : > { %v1101_v13 = vpack.c.bf16 %v1100_v12, %v1100_v12 }
 0x560   : > { %1464 = vmatmul.mubr.msk.bf16.vlgmr.msra.gmra.mrb[20].mxu0 %vm513_vm1, %v1101_v13 }
 0x633   : > { %v1162_v15 = vpop.f32.mrb[20].mxu0 }
 0x634   : > { %v1163_v16 = vadd.f32 %v1362_v14, %v1162_v15  ;;  %v1465_v17 = vpop.f32.mrb[21].mxu0 }
 0x635   : > { %v1165_v19 = vpop.f32.mrb[22].mxu0 }
 0x636   : > { %v1466_v20 = vpop.f32.mrb[23].mxu0  ;;  %v1168_v21 = vadd.f32 %v1163_v16, %v1997_v6 }
 0x638   : > { %v1169_v22 = vsel %vm513_vm1, %v1168_v21, 0.0 }
 0x639   : > { %1170 = vadd.xlane.f32.xlu1 %v1169_v22 }
 0x6c6   : > { %v1171_v23 = vpop.xlane.xlu1 %1170 }
 0x6c7   : > { %v1173_v24 = vmul.f32 0.03125, %v1171_v23 }
 0x6c9   : > { %v1174_v25 = vsub.f32 %v1168_v21, %v1173_v24 }
 0x6cb   : > { %v1175_v26 = vmul.f32 %v1174_v25, %v1174_v25 }
 0x6cd   : > { %v1176_v27 = vsel %vm513_vm1, %v1175_v26, 0.0 }
 0x6ce   : > { %1177 = vadd.xlane.f32.xlu0 %v1176_v27 }
 0x75b   : > { %v1178_v28 = vpop.xlane.xlu0 %1177 }
 0x75c   : > { %v1179_v29 = vmul.f32 0.03125, %v1178_v28 }
 0x75e   : > { %v1180_v30 = vadd.f32 1e-06, %v1179_v29 }
 0x760   : > { %1562 = vrsqrt.f32 %v1180_v30 }
 0x76a   : > { %v1563_v31 = vpop.eup %1562 }
 0x76b   : > { %v1182_v33 = vmul.f32 %v1563_v31, %v1174_v25 }
 0x76d   : > { %v1190_v6 = vmul.f32 %v1366_v32, %v1182_v33 }
 0x76f   : > { %v1198_v18 = vadd.f32 %v1367_v34, %v1190_v6 }
 0x771   : > { %1199 = vst.msk [vmem:[%s480_s14] sm:$0xff] %vm513_vm1, %v1198_v18 }
 0x772 PF: > { %s2115_s16 = sld [smem:[#allocation14_spill]] }
 0x778   : > { %s24_s17 = sadd.s32 1, %s2115_s16  }
 0x779   : > { %p21_p6 = scmp.ge.s32.totalorder %s24_s17, 4  }
 0x77b   :  { %23 = sbr.rel (!%p21_p6) target bundleno = 3 (0x3), region = 121 }
 0x782   :  { %1219 = vsyncpa [#allocation4], 1 }
 0x783   :  { %1221 = vsyncpa [#allocation4 + $0x1], 1 }
 0x784   :  { %1222 = vsyncpa [#allocation6], 1 }
 0x785   :  { %1223 = vsyncpa [#allocation9], 1 }

</bundles_post_ra>
